<compile_context>
chip_gen: v7x
topology: tpu7x:2x2x1
jax: 0.10.0
libtpu: 0.0.40
codegen_flags: <defaults>
</compile_context>

<pallas_src>
import jax
import jax.numpy as jnp
from jax import lax
from jax.experimental import pallas as pl
from jax.experimental.pallas import tpu as pltpu


# ----------------------------------------------------------------------------
# Fused kernel: hoisted input projection + 2-layer LSTM recurrence + batched
# vocab projection, one batch tile per grid step.
# ----------------------------------------------------------------------------
def _decoder_kernel(x_ref, wih0_ref, whh0_ref, wih1_ref, whh1_ref, wout_ref,
                    b0_ref, b1_ref, bout_ref, out_ref, xp_ref, h_ref):
    T, Bt, E = x_ref.shape
    H = whh0_ref.shape[0]
    V = wout_ref.shape[1]

    # Hoisted weight loads (bf16) and bias rows (f32, broadcasting adds only).
    whh0 = whh0_ref[...]            # (H, 4H) bf16
    wih1 = wih1_ref[...]            # (H, 4H) bf16
    whh1 = whh1_ref[...]            # (H, 4H) bf16
    b1 = b1_ref[...]                # (1, 4H) f32

    # --- Hoisted, non-recurrent input projection: one fat MXU matmul ---------
    x_flat = x_ref[...].reshape(T * Bt, E).astype(jnp.bfloat16)
    xproj = (jnp.dot(x_flat, wih0_ref[...], preferred_element_type=jnp.float32)
             + b0_ref[...])                                   # (T*Bt, 4H) f32
    xp_ref[...] = xproj.reshape(T, Bt, 4 * H)

    def gates_to_hc(g, c):
        # Full-width EUP ops on the (Bt, 4H) vreg, then static lane slices.
        sg = jax.nn.sigmoid(g)
        th = jnp.tanh(g)
        i = sg[:, 0 * H:1 * H]
        f = sg[:, 1 * H:2 * H]
        gg = th[:, 2 * H:3 * H]
        o = sg[:, 3 * H:4 * H]
        c_new = f * c + i * gg
        h_new = o * jnp.tanh(c_new)
        return h_new, c_new

    def step(t, carry):
        h0, c0, h1, c1 = carry
        # Layer 0: only the recurrent matmul sits on the serial path.
        g0 = xp_ref[t] + jnp.dot(h0.astype(jnp.bfloat16), whh0,
                                 preferred_element_type=jnp.float32)
        h0n, c0n = gates_to_hc(g0, c0)
        # TODO(synk): inter-layer dropout (p=0.15) omitted (eval semantics).
        # Layer 1: two small recurrent matmuls (no per-step lane concatenate).
        g1 = (jnp.dot(h0n.astype(jnp.bfloat16), wih1,
                      preferred_element_type=jnp.float32)
              + jnp.dot(h1.astype(jnp.bfloat16), whh1,
                        preferred_element_type=jnp.float32)
              + b1)
        h1n, c1n = gates_to_hc(g1, c1)
        h_ref[t] = h1n                       # stash hidden state, no V-wide work
        return (h0n, c0n, h1n, c1n)

    z = jnp.zeros((Bt, H), jnp.float32)
    lax.fori_loop(0, T, step, (z, z, z, z), unroll=True)

    # --- Batched vocab projection over all timesteps (dominant FLOPs) --------
    h_flat = h_ref[...].reshape(T * Bt, H).astype(jnp.bfloat16)   # time-major rows
    logits = (jnp.dot(h_flat, wout_ref[...], preferred_element_type=jnp.float32)
              + bout_ref[...]).astype(out_ref.dtype)              # (T*Bt, V)
    # Scatter time-major row blocks into the batch-major (Bt, T, V) output tile
    # with static slices (T is a Python int) — lane-dense stores, no wrapper
    # transpose of the logits and no in-kernel 3-D transpose.
    for t in range(T):
        out_ref[:, t, :] = logits[t * Bt:(t + 1) * Bt, :]


def decoder_forward_pallas(x_tbe, params, *, b_tile=None):
    """x_tbe: (T, B, E) f32 -> logits (B, T, V) f32 (batch-major)."""
    T, B, E = x_tbe.shape
    H = params["w_hh0"].shape[0]
    V = params["w_out"].shape[1]
    if b_tile is None:
        b_tile = 8 if (B % 8 == 0) else B
    assert B % b_tile == 0, (B, b_tile)

    bf = jnp.bfloat16
    weights = [params[k].astype(bf)
               for k in ("w_ih0", "w_hh0", "w_ih1", "w_hh1", "w_out")]
    biases = [params["b0"], params["b1"], params["b_out"]]

    def full(shape):
        return pl.BlockSpec(shape, lambda b: (0,) * len(shape))

    in_specs = [
        pl.BlockSpec((T, b_tile, E), lambda b: (0, b, 0)),   # x, tiled over batch
        full((E, 4 * H)), full((H, 4 * H)),                  # w_ih0, w_hh0
        full((H, 4 * H)), full((H, 4 * H)),                  # w_ih1, w_hh1
        full((H, V)),                                        # w_out
        full((1, 4 * H)), full((1, 4 * H)), full((1, V)),    # b0, b1, b_out
    ]
    out_specs = pl.BlockSpec((b_tile, T, V), lambda b: (b, 0, 0))

    return pl.pallas_call(
        _decoder_kernel,
        out_shape=jax.ShapeDtypeStruct((B, T, V), jnp.float32),
        grid_spec=pltpu.PrefetchScalarGridSpec(
            num_scalar_prefetch=0,
            grid=(B // b_tile,),
            in_specs=in_specs,
            out_specs=out_specs,
            scratch_shapes=[
                pltpu.VMEM((T, b_tile, 4 * H), jnp.float32),   # hoisted x-projection
                pltpu.VMEM((T, b_tile, H), jnp.float32),       # per-step h1 states
            ]),
        compiler_params=pltpu.CompilerParams(
            dimension_semantics=("parallel",),
            vmem_limit_bytes=32 * 1024 * 1024),
    )(x_tbe, *weights, *biases)


# ----------------------------------------------------------------------------
# Module wrapper (embedding lookup + layout glue in plain JAX)
# ----------------------------------------------------------------------------
def init_params(key, embed_size, hidden_size, vocab_size):
    E, H, V = embed_size, hidden_size, vocab_size
    ks = jax.random.split(key, 11)
    s = 0.1
    n = lambda k, shape: jax.random.normal(k, shape, jnp.float32) * s
    return {
        "embedding": n(ks[0], (V, E)),
        "w_ih0": n(ks[1], (E, 4 * H)),
        "w_hh0": n(ks[2], (H, 4 * H)),
        "b0": n(ks[3], (1, 4 * H)) + n(ks[4], (1, 4 * H)),   # b_ih0 + b_hh0
        "w_ih1": n(ks[5], (H, 4 * H)),
        "w_hh1": n(ks[6], (H, 4 * H)),
        "b1": n(ks[7], (1, 4 * H)) + n(ks[8], (1, 4 * H)),   # b_ih1 + b_hh1
        "w_out": n(ks[9], (H, V)),
        "b_out": n(ks[10], (1, V)),
    }


def decoder_rnn_forward(params, features, captions):
    """features: (B, E) f32, captions: (B, Tc) int32 -> logits (B, Tc, V)."""
    cap = captions[:, :-1]                                      # drop last token
    embed = jnp.take(params["embedding"], cap, axis=0)          # (B, Tc-1, E)
    x = jnp.concatenate([features[:, None, :], embed], axis=1)  # (B, T, E)
    x_tbe = jnp.transpose(x, (1, 0, 2))                         # time-major (T, B, E)
    # Kernel already emits batch-major (B, T, V): no output transpose.
    return decoder_forward_pallas(x_tbe, params)


# ----------------------------------------------------------------------------
# Pure-JAX f32 reference for correctness checking
# ----------------------------------------------------------------------------
def decoder_rnn_reference(params, features, captions):
    B, E = features.shape
    H = params["w_hh0"].shape[0]
    cap = captions[:, :-1]
    embed = jnp.take(params["embedding"], cap, axis=0)
    x = jnp.concatenate([features[:, None, :], embed], axis=1)
    x_tbe = jnp.transpose(x, (1, 0, 2))

    def cell(x_t, h, c, w_ih, w_hh, b):
        gates = x_t @ w_ih + h @ w_hh + b[0]
        i = jax.nn.sigmoid(gates[:, 0 * H:1 * H])
        f = jax.nn.sigmoid(gates[:, 1 * H:2 * H])
        g = jnp.tanh(gates[:, 2 * H:3 * H])
        o = jax.nn.sigmoid(gates[:, 3 * H:4 * H])
        c_new = f * c + i * g
        return o * jnp.tanh(c_new), c_new

    def step(carry, x_t):
        h0, c0, h1, c1 = carry
        h0, c0 = cell(x_t, h0, c0, params["w_ih0"], params["w_hh0"], params["b0"])
        h1, c1 = cell(h0, h1, c1, params["w_ih1"], params["w_hh1"], params["b1"])
        return (h0, c0, h1, c1), h1

    z = jnp.zeros((B, H), jnp.float32)
    _, hs = lax.scan(step, (z, z, z, z), x_tbe)                 # (T, B, H)
    lstm_out = jnp.transpose(hs, (1, 0, 2))                     # (B, T, H)
    T = lstm_out.shape[1]
    logits = lstm_out.reshape(B * T, H) @ params["w_out"] + params["b_out"][0]
    return logits.reshape(B, T, -1)


# ----------------------------------------------------------------------------
if __name__ == "__main__":
    embed_size = 64
    hidden_size = 32
    vocab_size = 128        # multiple of 128 -> lane-dense logit tiles
    batch_size = 8
    caption_len = 8         # T = caption_len (1 feature step + 7 token steps)

    key = jax.random.PRNGKey(0)
    kp, kf, kc = jax.random.split(key, 3)

    params = init_params(kp, embed_size, hidden_size, vocab_size)
    features = jax.random.normal(kf, (batch_size, embed_size), jnp.float32)
    captions = jax.random.randint(kc, (batch_size, caption_len), 0, vocab_size,
                                  dtype=jnp.int32)

    out = jax.block_until_ready(jax.jit(decoder_rnn_forward)(params, features, captions))
    ref = jax.block_until_ready(jax.jit(decoder_rnn_reference)(params, features, captions))

    assert out.shape == (batch_size, caption_len, vocab_size), out.shape
    max_err = float(jnp.max(jnp.abs(out - ref)))
    # bf16 MXU operands with f32 accumulation -> slightly looser tolerance than pure f32.
    assert jnp.allclose(out, ref, atol=2e-2, rtol=2e-2), max_err

    print("KERNEL_OK")
</pallas_src>

<mosaic_0001>
module attributes {stable_mosaic.version = 11 : i64} {
  func.func @_decoder_kernel(%arg0: i32, %arg1: memref<8x8x64xf32, #tpu.memory_space<vmem>>, %arg2: memref<64x128xbf16, #tpu.memory_space<vmem>>, %arg3: memref<32x128xbf16, #tpu.memory_space<vmem>>, %arg4: memref<32x128xbf16, #tpu.memory_space<vmem>>, %arg5: memref<32x128xbf16, #tpu.memory_space<vmem>>, %arg6: memref<32x128xbf16, #tpu.memory_space<vmem>>, %arg7: memref<1x128xf32, #tpu.memory_space<vmem>>, %arg8: memref<1x128xf32, #tpu.memory_space<vmem>>, %arg9: memref<1x128xf32, #tpu.memory_space<vmem>>, %arg10: memref<8x8x128xf32, #tpu.memory_space<vmem>>, %arg11: memref<8x8x128xf32, #tpu.memory_space<vmem>>, %arg12: memref<8x8x32xf32, #tpu.memory_space<vmem>>) attributes {dimension_semantics = [#tpu.dimension_semantics<parallel>], iteration_bounds = array<i64: 1>, scalar_prefetch = 0 : i64, scratch_operands = 2 : i64, tpu.core_type = #tpu.core_type<tc>, window_params = [{transform_indices = @transform_0, window_bounds = array<i64: 8, 8, 64>}, {pipeline_mode = #tpu.pipeline_mode<synchronous>, transform_indices = @transform_1, window_bounds = array<i64: 64, 128>}, {pipeline_mode = #tpu.pipeline_mode<synchronous>, transform_indices = @transform_2, window_bounds = array<i64: 32, 128>}, {pipeline_mode = #tpu.pipeline_mode<synchronous>, transform_indices = @transform_3, window_bounds = array<i64: 32, 128>}, {pipeline_mode = #tpu.pipeline_mode<synchronous>, transform_indices = @transform_4, window_bounds = array<i64: 32, 128>}, {pipeline_mode = #tpu.pipeline_mode<synchronous>, transform_indices = @transform_5, window_bounds = array<i64: 32, 128>}, {pipeline_mode = #tpu.pipeline_mode<synchronous>, transform_indices = @transform_6, window_bounds = array<i64: 1, 128>}, {pipeline_mode = #tpu.pipeline_mode<synchronous>, transform_indices = @transform_7, window_bounds = array<i64: 1, 128>}, {pipeline_mode = #tpu.pipeline_mode<synchronous>, transform_indices = @transform_8, window_bounds = array<i64: 1, 128>}, {transform_indices = @transform_9, window_bounds = array<i64: 8, 8, 128>}]} {
    %c0 = arith.constant 0 : index
    %c0_0 = arith.constant 0 : index
    %0 = vector.load %arg3[%c0, %c0_0] : memref<32x128xbf16, #tpu.memory_space<vmem>>, vector<32x128xbf16>
    %c0_1 = arith.constant 0 : index
    %c0_2 = arith.constant 0 : index
    %1 = vector.load %arg4[%c0_1, %c0_2] : memref<32x128xbf16, #tpu.memory_space<vmem>>, vector<32x128xbf16>
    %c0_3 = arith.constant 0 : index
    %c0_4 = arith.constant 0 : index
    %2 = vector.load %arg5[%c0_3, %c0_4] : memref<32x128xbf16, #tpu.memory_space<vmem>>, vector<32x128xbf16>
    %c0_5 = arith.constant 0 : index
    %c0_6 = arith.constant 0 : index
    %3 = vector.load %arg8[%c0_5, %c0_6] : memref<1x128xf32, #tpu.memory_space<vmem>>, vector<1x128xf32>
    %c0_7 = arith.constant 0 : index
    %c0_8 = arith.constant 0 : index
    %c0_9 = arith.constant 0 : index
    %4 = vector.load %arg1[%c0_7, %c0_8, %c0_9] : memref<8x8x64xf32, #tpu.memory_space<vmem>>, vector<8x8x64xf32>
    %5 = vector.shape_cast %4 : vector<8x8x64xf32> to vector<64x64xf32>
    %6 = arith.truncf %5 : vector<64x64xf32> to vector<64x64xbf16>
    %c0_10 = arith.constant 0 : index
    %c0_11 = arith.constant 0 : index
    %7 = vector.load %arg2[%c0_10, %c0_11] : memref<64x128xbf16, #tpu.memory_space<vmem>>, vector<64x128xbf16>
    %cst = arith.constant dense<0.000000e+00> : vector<64x128xf32>
    %8 = tpu.matmul %6, %7, %cst {dimension_numbers = #tpu.dot_dimension_numbers<[1], [0], [0], [1], [0, 0, 1, 1], [], []>} : vector<64x64xbf16>, vector<64x128xbf16>, vector<64x128xf32> -> vector<64x128xf32>
    %c0_12 = arith.constant 0 : index
    %c0_13 = arith.constant 0 : index
    %9 = vector.load %arg7[%c0_12, %c0_13] : memref<1x128xf32, #tpu.memory_space<vmem>>, vector<1x128xf32>
    %10 = vector.broadcast %9 : vector<1x128xf32> to vector<64x128xf32>
    %11 = arith.addf %8, %10 : vector<64x128xf32>
    %12 = vector.shape_cast %11 : vector<64x128xf32> to vector<8x8x128xf32>
    %c0_14 = arith.constant 0 : index
    %c0_15 = arith.constant 0 : index
    %c0_16 = arith.constant 0 : index
    %13 = vector.load %arg11[%c0_14, %c0_15, %c0_16] : memref<8x8x128xf32, #tpu.memory_space<vmem>>, vector<8x8x128xf32>
    tpu.vector_store %arg11[%c0_14, %c0_15, %c0_16], %12 {strides = array<i32>} : memref<8x8x128xf32, #tpu.memory_space<vmem>>, vector<8x8x128xf32>,
    %cst_17 = arith.constant 0.000000e+00 : f32
    %14 = vector.broadcast %cst_17 : f32 to vector<8x32xf32>
    %c0_i32 = arith.constant 0 : i32
    %15 = arith.index_cast %c0_i32 : i32 to index
    %c0_18 = arith.constant 0 : index
    %c0_19 = arith.constant 0 : index
    %16 = vector.load %arg11[%15, %c0_18, %c0_19] : memref<8x8x128xf32, #tpu.memory_space<vmem>>, vector<1x8x128xf32>
    %17 = vector.shape_cast %16 : vector<1x8x128xf32> to vector<8x128xf32>
    %18 = arith.truncf %14 : vector<8x32xf32> to vector<8x32xbf16>
    %cst_20 = arith.constant dense<0.000000e+00> : vector<8x128xf32>
    %19 = tpu.matmul %18, %0, %cst_20 {dimension_numbers = #tpu.dot_dimension_numbers<[1], [0], [0], [1], [0, 0, 1, 1], [], []>} : vector<8x32xbf16>, vector<32x128xbf16>, vector<8x128xf32> -> vector<8x128xf32>
    %20 = arith.addf %17, %19 : vector<8x128xf32>
    %21 = arith.negf %20 : vector<8x128xf32>
    %22 = math.exp %21 : vector<8x128xf32>
    %cst_21 = arith.constant 1.000000e+00 : f32
    %23 = vector.broadcast %cst_21 : f32 to vector<8x128xf32>
    %24 = arith.addf %23, %22 : vector<8x128xf32>
    %25 = arith.divf %23, %24 : vector<8x128xf32>
    %26 = math.tanh %20 : vector<8x128xf32>
    %27 = vector.extract_strided_slice %25 {offsets = [0, 0], sizes = [8, 32], strides = [1, 1]} : vector<8x128xf32> to vector<8x32xf32>
    %28 = vector.extract_strided_slice %25 {offsets = [0, 32], sizes = [8, 32], strides = [1, 1]} : vector<8x128xf32> to vector<8x32xf32>
    %29 = vector.extract_strided_slice %26 {offsets = [0, 64], sizes = [8, 32], strides = [1, 1]} : vector<8x128xf32> to vector<8x32xf32>
    %30 = vector.extract_strided_slice %25 {offsets = [0, 96], sizes = [8, 32], strides = [1, 1]} : vector<8x128xf32> to vector<8x32xf32>
    %31 = arith.mulf %28, %14 : vector<8x32xf32>
    %32 = arith.mulf %27, %29 : vector<8x32xf32>
    %33 = arith.addf %31, %32 : vector<8x32xf32>
    %34 = math.tanh %33 : vector<8x32xf32>
    %35 = arith.mulf %30, %34 : vector<8x32xf32>
    %36 = arith.truncf %35 : vector<8x32xf32> to vector<8x32xbf16>
    %cst_22 = arith.constant dense<0.000000e+00> : vector<8x128xf32>
    %37 = tpu.matmul %36, %1, %cst_22 {dimension_numbers = #tpu.dot_dimension_numbers<[1], [0], [0], [1], [0, 0, 1, 1], [], []>} : vector<8x32xbf16>, vector<32x128xbf16>, vector<8x128xf32> -> vector<8x128xf32>
    %38 = arith.truncf %14 : vector<8x32xf32> to vector<8x32xbf16>
    %cst_23 = arith.constant dense<0.000000e+00> : vector<8x128xf32>
    %39 = tpu.matmul %38, %2, %cst_23 {dimension_numbers = #tpu.dot_dimension_numbers<[1], [0], [0], [1], [0, 0, 1, 1], [], []>} : vector<8x32xbf16>, vector<32x128xbf16>, vector<8x128xf32> -> vector<8x128xf32>
    %40 = arith.addf %37, %39 : vector<8x128xf32>
    %41 = vector.broadcast %3 : vector<1x128xf32> to vector<8x128xf32>
    %42 = arith.addf %40, %41 : vector<8x128xf32>
    %43 = arith.negf %42 : vector<8x128xf32>
    %44 = math.exp %43 : vector<8x128xf32>
    %cst_24 = arith.constant 1.000000e+00 : f32
    %45 = vector.broadcast %cst_24 : f32 to vector<8x128xf32>
    %46 = arith.addf %45, %44 : vector<8x128xf32>
    %47 = arith.divf %45, %46 : vector<8x128xf32>
    %48 = math.tanh %42 : vector<8x128xf32>
    %49 = vector.extract_strided_slice %47 {offsets = [0, 0], sizes = [8, 32], strides = [1, 1]} : vector<8x128xf32> to vector<8x32xf32>
    %50 = vector.extract_strided_slice %47 {offsets = [0, 32], sizes = [8, 32], strides = [1, 1]} : vector<8x128xf32> to vector<8x32xf32>
    %51 = vector.extract_strided_slice %48 {offsets = [0, 64], sizes = [8, 32], strides = [1, 1]} : vector<8x128xf32> to vector<8x32xf32>
    %52 = vector.extract_strided_slice %47 {offsets = [0, 96], sizes = [8, 32], strides = [1, 1]} : vector<8x128xf32> to vector<8x32xf32>
    %53 = arith.mulf %50, %14 : vector<8x32xf32>
    %54 = arith.mulf %49, %51 : vector<8x32xf32>
    %55 = arith.addf %53, %54 : vector<8x32xf32>
    %56 = math.tanh %55 : vector<8x32xf32>
    %57 = arith.mulf %52, %56 : vector<8x32xf32>
    %58 = arith.index_cast %c0_i32 : i32 to index
    %c0_25 = arith.constant 0 : index
    %c0_26 = arith.constant 0 : index
    %59 = vector.load %arg12[%58, %c0_25, %c0_26] : memref<8x8x32xf32, #tpu.memory_space<vmem>>, vector<1x8x32xf32>
    %60 = vector.shape_cast %59 : vector<1x8x32xf32> to vector<8x32xf32>
    %61 = vector.shape_cast %57 : vector<8x32xf32> to vector<1x8x32xf32>
    tpu.vector_store %arg12[%58, %c0_25, %c0_26], %61 {strides = array<i32>} : memref<8x8x32xf32, #tpu.memory_space<vmem>>, vector<1x8x32xf32>,
    %c1_i32 = arith.constant 1 : i32
    %62 = arith.index_cast %c1_i32 : i32 to index
    %c0_27 = arith.constant 0 : index
    %c0_28 = arith.constant 0 : index
    %63 = vector.load %arg11[%62, %c0_27, %c0_28] : memref<8x8x128xf32, #tpu.memory_space<vmem>>, vector<1x8x128xf32>
    %64 = vector.shape_cast %63 : vector<1x8x128xf32> to vector<8x128xf32>
    %65 = arith.truncf %35 : vector<8x32xf32> to vector<8x32xbf16>
    %cst_29 = arith.constant dense<0.000000e+00> : vector<8x128xf32>
    %66 = tpu.matmul %65, %0, %cst_29 {dimension_numbers = #tpu.dot_dimension_numbers<[1], [0], [0], [1], [0, 0, 1, 1], [], []>} : vector<8x32xbf16>, vector<32x128xbf16>, vector<8x128xf32> -> vector<8x128xf32>
    %67 = arith.addf %64, %66 : vector<8x128xf32>
    %68 = arith.negf %67 : vector<8x128xf32>
    %69 = math.exp %68 : vector<8x128xf32>
    %cst_30 = arith.constant 1.000000e+00 : f32
    %70 = vector.broadcast %cst_30 : f32 to vector<8x128xf32>
    %71 = arith.addf %70, %69 : vector<8x128xf32>
    %72 = arith.divf %70, %71 : vector<8x128xf32>
    %73 = math.tanh %67 : vector<8x128xf32>
    %74 = vector.extract_strided_slice %72 {offsets = [0, 0], sizes = [8, 32], strides = [1, 1]} : vector<8x128xf32> to vector<8x32xf32>
    %75 = vector.extract_strided_slice %72 {offsets = [0, 32], sizes = [8, 32], strides = [1, 1]} : vector<8x128xf32> to vector<8x32xf32>
    %76 = vector.extract_strided_slice %73 {offsets = [0, 64], sizes = [8, 32], strides = [1, 1]} : vector<8x128xf32> to vector<8x32xf32>
    %77 = vector.extract_strided_slice %72 {offsets = [0, 96], sizes = [8, 32], strides = [1, 1]} : vector<8x128xf32> to vector<8x32xf32>
    %78 = arith.mulf %75, %33 : vector<8x32xf32>
    %79 = arith.mulf %74, %76 : vector<8x32xf32>
    %80 = arith.addf %78, %79 : vector<8x32xf32>
    %81 = math.tanh %80 : vector<8x32xf32>
    %82 = arith.mulf %77, %81 : vector<8x32xf32>
    %83 = arith.truncf %82 : vector<8x32xf32> to vector<8x32xbf16>
    %cst_31 = arith.constant dense<0.000000e+00> : vector<8x128xf32>
    %84 = tpu.matmul %83, %1, %cst_31 {dimension_numbers = #tpu.dot_dimension_numbers<[1], [0], [0], [1], [0, 0, 1, 1], [], []>} : vector<8x32xbf16>, vector<32x128xbf16>, vector<8x128xf32> -> vector<8x128xf32>
    %85 = arith.truncf %57 : vector<8x32xf32> to vector<8x32xbf16>
    %cst_32 = arith.constant dense<0.000000e+00> : vector<8x128xf32>
    %86 = tpu.matmul %85, %2, %cst_32 {dimension_numbers = #tpu.dot_dimension_numbers<[1], [0], [0], [1], [0, 0, 1, 1], [], []>} : vector<8x32xbf16>, vector<32x128xbf16>, vector<8x128xf32> -> vector<8x128xf32>
    %87 = arith.addf %84, %86 : vector<8x128xf32>
    %88 = vector.broadcast %3 : vector<1x128xf32> to vector<8x128xf32>
    %89 = arith.addf %87, %88 : vector<8x128xf32>
    %90 = arith.negf %89 : vector<8x128xf32>
    %91 = math.exp %90 : vector<8x128xf32>
    %cst_33 = arith.constant 1.000000e+00 : f32
    %92 = vector.broadcast %cst_33 : f32 to vector<8x128xf32>
    %93 = arith.addf %92, %91 : vector<8x128xf32>
    %94 = arith.divf %92, %93 : vector<8x128xf32>
    %95 = math.tanh %89 : vector<8x128xf32>
    %96 = vector.extract_strided_slice %94 {offsets = [0, 0], sizes = [8, 32], strides = [1, 1]} : vector<8x128xf32> to vector<8x32xf32>
    %97 = vector.extract_strided_slice %94 {offsets = [0, 32], sizes = [8, 32], strides = [1, 1]} : vector<8x128xf32> to vector<8x32xf32>
    %98 = vector.extract_strided_slice %95 {offsets = [0, 64], sizes = [8, 32], strides = [1, 1]} : vector<8x128xf32> to vector<8x32xf32>
    %99 = vector.extract_strided_slice %94 {offsets = [0, 96], sizes = [8, 32], strides = [1, 1]} : vector<8x128xf32> to vector<8x32xf32>
    %100 = arith.mulf %97, %55 : vector<8x32xf32>
    %101 = arith.mulf %96, %98 : vector<8x32xf32>
    %102 = arith.addf %100, %101 : vector<8x32xf32>
    %103 = math.tanh %102 : vector<8x32xf32>
    %104 = arith.mulf %99, %103 : vector<8x32xf32>
    %105 = arith.index_cast %c1_i32 : i32 to index
    %c0_34 = arith.constant 0 : index
    %c0_35 = arith.constant 0 : index
    %106 = vector.load %arg12[%105, %c0_34, %c0_35] : memref<8x8x32xf32, #tpu.memory_space<vmem>>, vector<1x8x32xf32>
    %107 = vector.shape_cast %106 : vector<1x8x32xf32> to vector<8x32xf32>
    %108 = vector.shape_cast %104 : vector<8x32xf32> to vector<1x8x32xf32>
    tpu.vector_store %arg12[%105, %c0_34, %c0_35], %108 {strides = array<i32>} : memref<8x8x32xf32, #tpu.memory_space<vmem>>, vector<1x8x32xf32>,
    %c2_i32 = arith.constant 2 : i32
    %109 = arith.index_cast %c2_i32 : i32 to index
    %c0_36 = arith.constant 0 : index
    %c0_37 = arith.constant 0 : index
    %110 = vector.load %arg11[%109, %c0_36, %c0_37] : memref<8x8x128xf32, #tpu.memory_space<vmem>>, vector<1x8x128xf32>
    %111 = vector.shape_cast %110 : vector<1x8x128xf32> to vector<8x128xf32>
    %112 = arith.truncf %82 : vector<8x32xf32> to vector<8x32xbf16>
    %cst_38 = arith.constant dense<0.000000e+00> : vector<8x128xf32>
    %113 = tpu.matmul %112, %0, %cst_38 {dimension_numbers = #tpu.dot_dimension_numbers<[1], [0], [0], [1], [0, 0, 1, 1], [], []>} : vector<8x32xbf16>, vector<32x128xbf16>, vector<8x128xf32> -> vector<8x128xf32>
    %114 = arith.addf %111, %113 : vector<8x128xf32>
    %115 = arith.negf %114 : vector<8x128xf32>
    %116 = math.exp %115 : vector<8x128xf32>
    %cst_39 = arith.constant 1.000000e+00 : f32
    %117 = vector.broadcast %cst_39 : f32 to vector<8x128xf32>
    %118 = arith.addf %117, %116 : vector<8x128xf32>
    %119 = arith.divf %117, %118 : vector<8x128xf32>
    %120 = math.tanh %114 : vector<8x128xf32>
    %121 = vector.extract_strided_slice %119 {offsets = [0, 0], sizes = [8, 32], strides = [1, 1]} : vector<8x128xf32> to vector<8x32xf32>
    %122 = vector.extract_strided_slice %119 {offsets = [0, 32], sizes = [8, 32], strides = [1, 1]} : vector<8x128xf32> to vector<8x32xf32>
    %123 = vector.extract_strided_slice %120 {offsets = [0, 64], sizes = [8, 32], strides = [1, 1]} : vector<8x128xf32> to vector<8x32xf32>
    %124 = vector.extract_strided_slice %119 {offsets = [0, 96], sizes = [8, 32], strides = [1, 1]} : vector<8x128xf32> to vector<8x32xf32>
    %125 = arith.mulf %122, %80 : vector<8x32xf32>
    %126 = arith.mulf %121, %123 : vector<8x32xf32>
    %127 = arith.addf %125, %126 : vector<8x32xf32>
    %128 = math.tanh %127 : vector<8x32xf32>
    %129 = arith.mulf %124, %128 : vector<8x32xf32>
    %130 = arith.truncf %129 : vector<8x32xf32> to vector<8x32xbf16>
    %cst_40 = arith.constant dense<0.000000e+00> : vector<8x128xf32>
    %131 = tpu.matmul %130, %1, %cst_40 {dimension_numbers = #tpu.dot_dimension_numbers<[1], [0], [0], [1], [0, 0, 1, 1], [], []>} : vector<8x32xbf16>, vector<32x128xbf16>, vector<8x128xf32> -> vector<8x128xf32>
    %132 = arith.truncf %104 : vector<8x32xf32> to vector<8x32xbf16>
    %cst_41 = arith.constant dense<0.000000e+00> : vector<8x128xf32>
    %133 = tpu.matmul %132, %2, %cst_41 {dimension_numbers = #tpu.dot_dimension_numbers<[1], [0], [0], [1], [0, 0, 1, 1], [], []>} : vector<8x32xbf16>, vector<32x128xbf16>, vector<8x128xf32> -> vector<8x128xf32>
    %134 = arith.addf %131, %133 : vector<8x128xf32>
    %135 = vector.broadcast %3 : vector<1x128xf32> to vector<8x128xf32>
    %136 = arith.addf %134, %135 : vector<8x128xf32>
    %137 = arith.negf %136 : vector<8x128xf32>
    %138 = math.exp %137 : vector<8x128xf32>
    %cst_42 = arith.constant 1.000000e+00 : f32
    %139 = vector.broadcast %cst_42 : f32 to vector<8x128xf32>
    %140 = arith.addf %139, %138 : vector<8x128xf32>
    %141 = arith.divf %139, %140 : vector<8x128xf32>
    %142 = math.tanh %136 : vector<8x128xf32>
    %143 = vector.extract_strided_slice %141 {offsets = [0, 0], sizes = [8, 32], strides = [1, 1]} : vector<8x128xf32> to vector<8x32xf32>
    %144 = vector.extract_strided_slice %141 {offsets = [0, 32], sizes = [8, 32], strides = [1, 1]} : vector<8x128xf32> to vector<8x32xf32>
    %145 = vector.extract_strided_slice %142 {offsets = [0, 64], sizes = [8, 32], strides = [1, 1]} : vector<8x128xf32> to vector<8x32xf32>
    %146 = vector.extract_strided_slice %141 {offsets = [0, 96], sizes = [8, 32], strides = [1, 1]} : vector<8x128xf32> to vector<8x32xf32>
    %147 = arith.mulf %144, %102 : vector<8x32xf32>
    %148 = arith.mulf %143, %145 : vector<8x32xf32>
    %149 = arith.addf %147, %148 : vector<8x32xf32>
    %150 = math.tanh %149 : vector<8x32xf32>
    %151 = arith.mulf %146, %150 : vector<8x32xf32>
    %152 = arith.index_cast %c2_i32 : i32 to index
    %c0_43 = arith.constant 0 : index
    %c0_44 = arith.constant 0 : index
    %153 = vector.load %arg12[%152, %c0_43, %c0_44] : memref<8x8x32xf32, #tpu.memory_space<vmem>>, vector<1x8x32xf32>
    %154 = vector.shape_cast %153 : vector<1x8x32xf32> to vector<8x32xf32>
    %155 = vector.shape_cast %151 : vector<8x32xf32> to vector<1x8x32xf32>
    tpu.vector_store %arg12[%152, %c0_43, %c0_44], %155 {strides = array<i32>} : memref<8x8x32xf32, #tpu.memory_space<vmem>>, vector<1x8x32xf32>,
    %c3_i32 = arith.constant 3 : i32
    %156 = arith.index_cast %c3_i32 : i32 to index
    %c0_45 = arith.constant 0 : index
    %c0_46 = arith.constant 0 : index
    %157 = vector.load %arg11[%156, %c0_45, %c0_46] : memref<8x8x128xf32, #tpu.memory_space<vmem>>, vector<1x8x128xf32>
    %158 = vector.shape_cast %157 : vector<1x8x128xf32> to vector<8x128xf32>
    %159 = arith.truncf %129 : vector<8x32xf32> to vector<8x32xbf16>
    %cst_47 = arith.constant dense<0.000000e+00> : vector<8x128xf32>
    %160 = tpu.matmul %159, %0, %cst_47 {dimension_numbers = #tpu.dot_dimension_numbers<[1], [0], [0], [1], [0, 0, 1, 1], [], []>} : vector<8x32xbf16>, vector<32x128xbf16>, vector<8x128xf32> -> vector<8x128xf32>
    %161 = arith.addf %158, %160 : vector<8x128xf32>
    %162 = arith.negf %161 : vector<8x128xf32>
    %163 = math.exp %162 : vector<8x128xf32>
    %cst_48 = arith.constant 1.000000e+00 : f32
    %164 = vector.broadcast %cst_48 : f32 to vector<8x128xf32>
    %165 = arith.addf %164, %163 : vector<8x128xf32>
    %166 = arith.divf %164, %165 : vector<8x128xf32>
    %167 = math.tanh %161 : vector<8x128xf32>
    %168 = vector.extract_strided_slice %166 {offsets = [0, 0], sizes = [8, 32], strides = [1, 1]} : vector<8x128xf32> to vector<8x32xf32>
    %169 = vector.extract_strided_slice %166 {offsets = [0, 32], sizes = [8, 32], strides = [1, 1]} : vector<8x128xf32> to vector<8x32xf32>
    %170 = vector.extract_strided_slice %167 {offsets = [0, 64], sizes = [8, 32], strides = [1, 1]} : vector<8x128xf32> to vector<8x32xf32>
    %171 = vector.extract_strided_slice %166 {offsets = [0, 96], sizes = [8, 32], strides = [1, 1]} : vector<8x128xf32> to vector<8x32xf32>
    %172 = arith.mulf %169, %127 : vector<8x32xf32>
    %173 = arith.mulf %168, %170 : vector<8x32xf32>
    %174 = arith.addf %172, %173 : vector<8x32xf32>
    %175 = math.tanh %174 : vector<8x32xf32>
    %176 = arith.mulf %171, %175 : vector<8x32xf32>
    %177 = arith.truncf %176 : vector<8x32xf32> to vector<8x32xbf16>
    %cst_49 = arith.constant dense<0.000000e+00> : vector<8x128xf32>
    %178 = tpu.matmul %177, %1, %cst_49 {dimension_numbers = #tpu.dot_dimension_numbers<[1], [0], [0], [1], [0, 0, 1, 1], [], []>} : vector<8x32xbf16>, vector<32x128xbf16>, vector<8x128xf32> -> vector<8x128xf32>
    %179 = arith.truncf %151 : vector<8x32xf32> to vector<8x32xbf16>
    %cst_50 = arith.constant dense<0.000000e+00> : vector<8x128xf32>
    %180 = tpu.matmul %179, %2, %cst_50 {dimension_numbers = #tpu.dot_dimension_numbers<[1], [0], [0], [1], [0, 0, 1, 1], [], []>} : vector<8x32xbf16>, vector<32x128xbf16>, vector<8x128xf32> -> vector<8x128xf32>
    %181 = arith.addf %178, %180 : vector<8x128xf32>
    %182 = vector.broadcast %3 : vector<1x128xf32> to vector<8x128xf32>
    %183 = arith.addf %181, %182 : vector<8x128xf32>
    %184 = arith.negf %183 : vector<8x128xf32>
    %185 = math.exp %184 : vector<8x128xf32>
    %cst_51 = arith.constant 1.000000e+00 : f32
    %186 = vector.broadcast %cst_51 : f32 to vector<8x128xf32>
    %187 = arith.addf %186, %185 : vector<8x128xf32>
    %188 = arith.divf %186, %187 : vector<8x128xf32>
    %189 = math.tanh %183 : vector<8x128xf32>
    %190 = vector.extract_strided_slice %188 {offsets = [0, 0], sizes = [8, 32], strides = [1, 1]} : vector<8x128xf32> to vector<8x32xf32>
    %191 = vector.extract_strided_slice %188 {offsets = [0, 32], sizes = [8, 32], strides = [1, 1]} : vector<8x128xf32> to vector<8x32xf32>
    %192 = vector.extract_strided_slice %189 {offsets = [0, 64], sizes = [8, 32], strides = [1, 1]} : vector<8x128xf32> to vector<8x32xf32>
    %193 = vector.extract_strided_slice %188 {offsets = [0, 96], sizes = [8, 32], strides = [1, 1]} : vector<8x128xf32> to vector<8x32xf32>
    %194 = arith.mulf %191, %149 : vector<8x32xf32>
    %195 = arith.mulf %190, %192 : vector<8x32xf32>
    %196 = arith.addf %194, %195 : vector<8x32xf32>
    %197 = math.tanh %196 : vector<8x32xf32>
    %198 = arith.mulf %193, %197 : vector<8x32xf32>
    %199 = arith.index_cast %c3_i32 : i32 to index
    %c0_52 = arith.constant 0 : index
    %c0_53 = arith.constant 0 : index
    %200 = vector.load %arg12[%199, %c0_52, %c0_53] : memref<8x8x32xf32, #tpu.memory_space<vmem>>, vector<1x8x32xf32>
    %201 = vector.shape_cast %200 : vector<1x8x32xf32> to vector<8x32xf32>
    %202 = vector.shape_cast %198 : vector<8x32xf32> to vector<1x8x32xf32>
    tpu.vector_store %arg12[%199, %c0_52, %c0_53], %202 {strides = array<i32>} : memref<8x8x32xf32, #tpu.memory_space<vmem>>, vector<1x8x32xf32>,
    %c4_i32 = arith.constant 4 : i32
    %203 = arith.index_cast %c4_i32 : i32 to index
    %c0_54 = arith.constant 0 : index
    %c0_55 = arith.constant 0 : index
    %204 = vector.load %arg11[%203, %c0_54, %c0_55] : memref<8x8x128xf32, #tpu.memory_space<vmem>>, vector<1x8x128xf32>
    %205 = vector.shape_cast %204 : vector<1x8x128xf32> to vector<8x128xf32>
    %206 = arith.truncf %176 : vector<8x32xf32> to vector<8x32xbf16>
    %cst_56 = arith.constant dense<0.000000e+00> : vector<8x128xf32>
    %207 = tpu.matmul %206, %0, %cst_56 {dimension_numbers = #tpu.dot_dimension_numbers<[1], [0], [0], [1], [0, 0, 1, 1], [], []>} : vector<8x32xbf16>, vector<32x128xbf16>, vector<8x128xf32> -> vector<8x128xf32>
    %208 = arith.addf %205, %207 : vector<8x128xf32>
    %209 = arith.negf %208 : vector<8x128xf32>
    %210 = math.exp %209 : vector<8x128xf32>
    %cst_57 = arith.constant 1.000000e+00 : f32
    %211 = vector.broadcast %cst_57 : f32 to vector<8x128xf32>
    %212 = arith.addf %211, %210 : vector<8x128xf32>
    %213 = arith.divf %211, %212 : vector<8x128xf32>
    %214 = math.tanh %208 : vector<8x128xf32>
    %215 = vector.extract_strided_slice %213 {offsets = [0, 0], sizes = [8, 32], strides = [1, 1]} : vector<8x128xf32> to vector<8x32xf32>
    %216 = vector.extract_strided_slice %213 {offsets = [0, 32], sizes = [8, 32], strides = [1, 1]} : vector<8x128xf32> to vector<8x32xf32>
    %217 = vector.extract_strided_slice %214 {offsets = [0, 64], sizes = [8, 32], strides = [1, 1]} : vector<8x128xf32> to vector<8x32xf32>
    %218 = vector.extract_strided_slice %213 {offsets = [0, 96], sizes = [8, 32], strides = [1, 1]} : vector<8x128xf32> to vector<8x32xf32>
    %219 = arith.mulf %216, %174 : vector<8x32xf32>
    %220 = arith.mulf %215, %217 : vector<8x32xf32>
    %221 = arith.addf %219, %220 : vector<8x32xf32>
    %222 = math.tanh %221 : vector<8x32xf32>
    %223 = arith.mulf %218, %222 : vector<8x32xf32>
    %224 = arith.truncf %223 : vector<8x32xf32> to vector<8x32xbf16>
    %cst_58 = arith.constant dense<0.000000e+00> : vector<8x128xf32>
    %225 = tpu.matmul %224, %1, %cst_58 {dimension_numbers = #tpu.dot_dimension_numbers<[1], [0], [0], [1], [0, 0, 1, 1], [], []>} : vector<8x32xbf16>, vector<32x128xbf16>, vector<8x128xf32> -> vector<8x128xf32>
    %226 = arith.truncf %198 : vector<8x32xf32> to vector<8x32xbf16>
    %cst_59 = arith.constant dense<0.000000e+00> : vector<8x128xf32>
    %227 = tpu.matmul %226, %2, %cst_59 {dimension_numbers = #tpu.dot_dimension_numbers<[1], [0], [0], [1], [0, 0, 1, 1], [], []>} : vector<8x32xbf16>, vector<32x128xbf16>, vector<8x128xf32> -> vector<8x128xf32>
    %228 = arith.addf %225, %227 : vector<8x128xf32>
    %229 = vector.broadcast %3 : vector<1x128xf32> to vector<8x128xf32>
    %230 = arith.addf %228, %229 : vector<8x128xf32>
    %231 = arith.negf %230 : vector<8x128xf32>
    %232 = math.exp %231 : vector<8x128xf32>
    %cst_60 = arith.constant 1.000000e+00 : f32
    %233 = vector.broadcast %cst_60 : f32 to vector<8x128xf32>
    %234 = arith.addf %233, %232 : vector<8x128xf32>
    %235 = arith.divf %233, %234 : vector<8x128xf32>
    %236 = math.tanh %230 : vector<8x128xf32>
    %237 = vector.extract_strided_slice %235 {offsets = [0, 0], sizes = [8, 32], strides = [1, 1]} : vector<8x128xf32> to vector<8x32xf32>
    %238 = vector.extract_strided_slice %235 {offsets = [0, 32], sizes = [8, 32], strides = [1, 1]} : vector<8x128xf32> to vector<8x32xf32>
    %239 = vector.extract_strided_slice %236 {offsets = [0, 64], sizes = [8, 32], strides = [1, 1]} : vector<8x128xf32> to vector<8x32xf32>
    %240 = vector.extract_strided_slice %235 {offsets = [0, 96], sizes = [8, 32], strides = [1, 1]} : vector<8x128xf32> to vector<8x32xf32>
    %241 = arith.mulf %238, %196 : vector<8x32xf32>
    %242 = arith.mulf %237, %239 : vector<8x32xf32>
    %243 = arith.addf %241, %242 : vector<8x32xf32>
    %244 = math.tanh %243 : vector<8x32xf32>
    %245 = arith.mulf %240, %244 : vector<8x32xf32>
    %246 = arith.index_cast %c4_i32 : i32 to index
    %c0_61 = arith.constant 0 : index
    %c0_62 = arith.constant 0 : index
    %247 = vector.load %arg12[%246, %c0_61, %c0_62] : memref<8x8x32xf32, #tpu.memory_space<vmem>>, vector<1x8x32xf32>
    %248 = vector.shape_cast %247 : vector<1x8x32xf32> to vector<8x32xf32>
    %249 = vector.shape_cast %245 : vector<8x32xf32> to vector<1x8x32xf32>
    tpu.vector_store %arg12[%246, %c0_61, %c0_62], %249 {strides = array<i32>} : memref<8x8x32xf32, #tpu.memory_space<vmem>>, vector<1x8x32xf32>,
    %c5_i32 = arith.constant 5 : i32
    %250 = arith.index_cast %c5_i32 : i32 to index
    %c0_63 = arith.constant 0 : index
    %c0_64 = arith.constant 0 : index
    %251 = vector.load %arg11[%250, %c0_63, %c0_64] : memref<8x8x128xf32, #tpu.memory_space<vmem>>, vector<1x8x128xf32>
    %252 = vector.shape_cast %251 : vector<1x8x128xf32> to vector<8x128xf32>
    %253 = arith.truncf %223 : vector<8x32xf32> to vector<8x32xbf16>
    %cst_65 = arith.constant dense<0.000000e+00> : vector<8x128xf32>
    %254 = tpu.matmul %253, %0, %cst_65 {dimension_numbers = #tpu.dot_dimension_numbers<[1], [0], [0], [1], [0, 0, 1, 1], [], []>} : vector<8x32xbf16>, vector<32x128xbf16>, vector<8x128xf32> -> vector<8x128xf32>
    %255 = arith.addf %252, %254 : vector<8x128xf32>
    %256 = arith.negf %255 : vector<8x128xf32>
    %257 = math.exp %256 : vector<8x128xf32>
    %cst_66 = arith.constant 1.000000e+00 : f32
    %258 = vector.broadcast %cst_66 : f32 to vector<8x128xf32>
    %259 = arith.addf %258, %257 : vector<8x128xf32>
    %260 = arith.divf %258, %259 : vector<8x128xf32>
    %261 = math.tanh %255 : vector<8x128xf32>
    %262 = vector.extract_strided_slice %260 {offsets = [0, 0], sizes = [8, 32], strides = [1, 1]} : vector<8x128xf32> to vector<8x32xf32>
    %263 = vector.extract_strided_slice %260 {offsets = [0, 32], sizes = [8, 32], strides = [1, 1]} : vector<8x128xf32> to vector<8x32xf32>
    %264 = vector.extract_strided_slice %261 {offsets = [0, 64], sizes = [8, 32], strides = [1, 1]} : vector<8x128xf32> to vector<8x32xf32>
    %265 = vector.extract_strided_slice %260 {offsets = [0, 96], sizes = [8, 32], strides = [1, 1]} : vector<8x128xf32> to vector<8x32xf32>
    %266 = arith.mulf %263, %221 : vector<8x32xf32>
    %267 = arith.mulf %262, %264 : vector<8x32xf32>
    %268 = arith.addf %266, %267 : vector<8x32xf32>
    %269 = math.tanh %268 : vector<8x32xf32>
    %270 = arith.mulf %265, %269 : vector<8x32xf32>
    %271 = arith.truncf %270 : vector<8x32xf32> to vector<8x32xbf16>
    %cst_67 = arith.constant dense<0.000000e+00> : vector<8x128xf32>
    %272 = tpu.matmul %271, %1, %cst_67 {dimension_numbers = #tpu.dot_dimension_numbers<[1], [0], [0], [1], [0, 0, 1, 1], [], []>} : vector<8x32xbf16>, vector<32x128xbf16>, vector<8x128xf32> -> vector<8x128xf32>
    %273 = arith.truncf %245 : vector<8x32xf32> to vector<8x32xbf16>
    %cst_68 = arith.constant dense<0.000000e+00> : vector<8x128xf32>
    %274 = tpu.matmul %273, %2, %cst_68 {dimension_numbers = #tpu.dot_dimension_numbers<[1], [0], [0], [1], [0, 0, 1, 1], [], []>} : vector<8x32xbf16>, vector<32x128xbf16>, vector<8x128xf32> -> vector<8x128xf32>
    %275 = arith.addf %272, %274 : vector<8x128xf32>
    %276 = vector.broadcast %3 : vector<1x128xf32> to vector<8x128xf32>
    %277 = arith.addf %275, %276 : vector<8x128xf32>
    %278 = arith.negf %277 : vector<8x128xf32>
    %279 = math.exp %278 : vector<8x128xf32>
    %cst_69 = arith.constant 1.000000e+00 : f32
    %280 = vector.broadcast %cst_69 : f32 to vector<8x128xf32>
    %281 = arith.addf %280, %279 : vector<8x128xf32>
    %282 = arith.divf %280, %281 : vector<8x128xf32>
    %283 = math.tanh %277 : vector<8x128xf32>
    %284 = vector.extract_strided_slice %282 {offsets = [0, 0], sizes = [8, 32], strides = [1, 1]} : vector<8x128xf32> to vector<8x32xf32>
    %285 = vector.extract_strided_slice %282 {offsets = [0, 32], sizes = [8, 32], strides = [1, 1]} : vector<8x128xf32> to vector<8x32xf32>
    %286 = vector.extract_strided_slice %283 {offsets = [0, 64], sizes = [8, 32], strides = [1, 1]} : vector<8x128xf32> to vector<8x32xf32>
    %287 = vector.extract_strided_slice %282 {offsets = [0, 96], sizes = [8, 32], strides = [1, 1]} : vector<8x128xf32> to vector<8x32xf32>
    %288 = arith.mulf %285, %243 : vector<8x32xf32>
    %289 = arith.mulf %284, %286 : vector<8x32xf32>
    %290 = arith.addf %288, %289 : vector<8x32xf32>
    %291 = math.tanh %290 : vector<8x32xf32>
    %292 = arith.mulf %287, %291 : vector<8x32xf32>
    %293 = arith.index_cast %c5_i32 : i32 to index
    %c0_70 = arith.constant 0 : index
    %c0_71 = arith.constant 0 : index
    %294 = vector.load %arg12[%293, %c0_70, %c0_71] : memref<8x8x32xf32, #tpu.memory_space<vmem>>, vector<1x8x32xf32>
    %295 = vector.shape_cast %294 : vector<1x8x32xf32> to vector<8x32xf32>
    %296 = vector.shape_cast %292 : vector<8x32xf32> to vector<1x8x32xf32>
    tpu.vector_store %arg12[%293, %c0_70, %c0_71], %296 {strides = array<i32>} : memref<8x8x32xf32, #tpu.memory_space<vmem>>, vector<1x8x32xf32>,
    %c6_i32 = arith.constant 6 : i32
    %297 = arith.index_cast %c6_i32 : i32 to index
    %c0_72 = arith.constant 0 : index
    %c0_73 = arith.constant 0 : index
    %298 = vector.load %arg11[%297, %c0_72, %c0_73] : memref<8x8x128xf32, #tpu.memory_space<vmem>>, vector<1x8x128xf32>
    %299 = vector.shape_cast %298 : vector<1x8x128xf32> to vector<8x128xf32>
    %300 = arith.truncf %270 : vector<8x32xf32> to vector<8x32xbf16>
    %cst_74 = arith.constant dense<0.000000e+00> : vector<8x128xf32>
    %301 = tpu.matmul %300, %0, %cst_74 {dimension_numbers = #tpu.dot_dimension_numbers<[1], [0], [0], [1], [0, 0, 1, 1], [], []>} : vector<8x32xbf16>, vector<32x128xbf16>, vector<8x128xf32> -> vector<8x128xf32>
    %302 = arith.addf %299, %301 : vector<8x128xf32>
    %303 = arith.negf %302 : vector<8x128xf32>
    %304 = math.exp %303 : vector<8x128xf32>
    %cst_75 = arith.constant 1.000000e+00 : f32
    %305 = vector.broadcast %cst_75 : f32 to vector<8x128xf32>
    %306 = arith.addf %305, %304 : vector<8x128xf32>
    %307 = arith.divf %305, %306 : vector<8x128xf32>
    %308 = math.tanh %302 : vector<8x128xf32>
    %309 = vector.extract_strided_slice %307 {offsets = [0, 0], sizes = [8, 32], strides = [1, 1]} : vector<8x128xf32> to vector<8x32xf32>
    %310 = vector.extract_strided_slice %307 {offsets = [0, 32], sizes = [8, 32], strides = [1, 1]} : vector<8x128xf32> to vector<8x32xf32>
    %311 = vector.extract_strided_slice %308 {offsets = [0, 64], sizes = [8, 32], strides = [1, 1]} : vector<8x128xf32> to vector<8x32xf32>
    %312 = vector.extract_strided_slice %307 {offsets = [0, 96], sizes = [8, 32], strides = [1, 1]} : vector<8x128xf32> to vector<8x32xf32>
    %313 = arith.mulf %310, %268 : vector<8x32xf32>
    %314 = arith.mulf %309, %311 : vector<8x32xf32>
    %315 = arith.addf %313, %314 : vector<8x32xf32>
    %316 = math.tanh %315 : vector<8x32xf32>
    %317 = arith.mulf %312, %316 : vector<8x32xf32>
    %318 = arith.truncf %317 : vector<8x32xf32> to vector<8x32xbf16>
    %cst_76 = arith.constant dense<0.000000e+00> : vector<8x128xf32>
    %319 = tpu.matmul %318, %1, %cst_76 {dimension_numbers = #tpu.dot_dimension_numbers<[1], [0], [0], [1], [0, 0, 1, 1], [], []>} : vector<8x32xbf16>, vector<32x128xbf16>, vector<8x128xf32> -> vector<8x128xf32>
    %320 = arith.truncf %292 : vector<8x32xf32> to vector<8x32xbf16>
    %cst_77 = arith.constant dense<0.000000e+00> : vector<8x128xf32>
    %321 = tpu.matmul %320, %2, %cst_77 {dimension_numbers = #tpu.dot_dimension_numbers<[1], [0], [0], [1], [0, 0, 1, 1], [], []>} : vector<8x32xbf16>, vector<32x128xbf16>, vector<8x128xf32> -> vector<8x128xf32>
    %322 = arith.addf %319, %321 : vector<8x128xf32>
    %323 = vector.broadcast %3 : vector<1x128xf32> to vector<8x128xf32>
    %324 = arith.addf %322, %323 : vector<8x128xf32>
    %325 = arith.negf %324 : vector<8x128xf32>
    %326 = math.exp %325 : vector<8x128xf32>
    %cst_78 = arith.constant 1.000000e+00 : f32
    %327 = vector.broadcast %cst_78 : f32 to vector<8x128xf32>
    %328 = arith.addf %327, %326 : vector<8x128xf32>
    %329 = arith.divf %327, %328 : vector<8x128xf32>
    %330 = math.tanh %324 : vector<8x128xf32>
    %331 = vector.extract_strided_slice %329 {offsets = [0, 0], sizes = [8, 32], strides = [1, 1]} : vector<8x128xf32> to vector<8x32xf32>
    %332 = vector.extract_strided_slice %329 {offsets = [0, 32], sizes = [8, 32], strides = [1, 1]} : vector<8x128xf32> to vector<8x32xf32>
    %333 = vector.extract_strided_slice %330 {offsets = [0, 64], sizes = [8, 32], strides = [1, 1]} : vector<8x128xf32> to vector<8x32xf32>
    %334 = vector.extract_strided_slice %329 {offsets = [0, 96], sizes = [8, 32], strides = [1, 1]} : vector<8x128xf32> to vector<8x32xf32>
    %335 = arith.mulf %332, %290 : vector<8x32xf32>
    %336 = arith.mulf %331, %333 : vector<8x32xf32>
    %337 = arith.addf %335, %336 : vector<8x32xf32>
    %338 = math.tanh %337 : vector<8x32xf32>
    %339 = arith.mulf %334, %338 : vector<8x32xf32>
    %340 = arith.index_cast %c6_i32 : i32 to index
    %c0_79 = arith.constant 0 : index
    %c0_80 = arith.constant 0 : index
    %341 = vector.load %arg12[%340, %c0_79, %c0_80] : memref<8x8x32xf32, #tpu.memory_space<vmem>>, vector<1x8x32xf32>
    %342 = vector.shape_cast %341 : vector<1x8x32xf32> to vector<8x32xf32>
    %343 = vector.shape_cast %339 : vector<8x32xf32> to vector<1x8x32xf32>
    tpu.vector_store %arg12[%340, %c0_79, %c0_80], %343 {strides = array<i32>} : memref<8x8x32xf32, #tpu.memory_space<vmem>>, vector<1x8x32xf32>,
    %c7_i32 = arith.constant 7 : i32
    %344 = arith.index_cast %c7_i32 : i32 to index
    %c0_81 = arith.constant 0 : index
    %c0_82 = arith.constant 0 : index
    %345 = vector.load %arg11[%344, %c0_81, %c0_82] : memref<8x8x128xf32, #tpu.memory_space<vmem>>, vector<1x8x128xf32>
    %346 = vector.shape_cast %345 : vector<1x8x128xf32> to vector<8x128xf32>
    %347 = arith.truncf %317 : vector<8x32xf32> to vector<8x32xbf16>
    %cst_83 = arith.constant dense<0.000000e+00> : vector<8x128xf32>
    %348 = tpu.matmul %347, %0, %cst_83 {dimension_numbers = #tpu.dot_dimension_numbers<[1], [0], [0], [1], [0, 0, 1, 1], [], []>} : vector<8x32xbf16>, vector<32x128xbf16>, vector<8x128xf32> -> vector<8x128xf32>
    %349 = arith.addf %346, %348 : vector<8x128xf32>
    %350 = arith.negf %349 : vector<8x128xf32>
    %351 = math.exp %350 : vector<8x128xf32>
    %cst_84 = arith.constant 1.000000e+00 : f32
    %352 = vector.broadcast %cst_84 : f32 to vector<8x128xf32>
    %353 = arith.addf %352, %351 : vector<8x128xf32>
    %354 = arith.divf %352, %353 : vector<8x128xf32>
    %355 = math.tanh %349 : vector<8x128xf32>
    %356 = vector.extract_strided_slice %354 {offsets = [0, 0], sizes = [8, 32], strides = [1, 1]} : vector<8x128xf32> to vector<8x32xf32>
    %357 = vector.extract_strided_slice %354 {offsets = [0, 32], sizes = [8, 32], strides = [1, 1]} : vector<8x128xf32> to vector<8x32xf32>
    %358 = vector.extract_strided_slice %355 {offsets = [0, 64], sizes = [8, 32], strides = [1, 1]} : vector<8x128xf32> to vector<8x32xf32>
    %359 = vector.extract_strided_slice %354 {offsets = [0, 96], sizes = [8, 32], strides = [1, 1]} : vector<8x128xf32> to vector<8x32xf32>
    %360 = arith.mulf %357, %315 : vector<8x32xf32>
    %361 = arith.mulf %356, %358 : vector<8x32xf32>
    %362 = arith.addf %360, %361 : vector<8x32xf32>
    %363 = math.tanh %362 : vector<8x32xf32>
    %364 = arith.mulf %359, %363 : vector<8x32xf32>
    %365 = arith.truncf %364 : vector<8x32xf32> to vector<8x32xbf16>
    %cst_85 = arith.constant dense<0.000000e+00> : vector<8x128xf32>
    %366 = tpu.matmul %365, %1, %cst_85 {dimension_numbers = #tpu.dot_dimension_numbers<[1], [0], [0], [1], [0, 0, 1, 1], [], []>} : vector<8x32xbf16>, vector<32x128xbf16>, vector<8x128xf32> -> vector<8x128xf32>
    %367 = arith.truncf %339 : vector<8x32xf32> to vector<8x32xbf16>
    %cst_86 = arith.constant dense<0.000000e+00> : vector<8x128xf32>
    %368 = tpu.matmul %367, %2, %cst_86 {dimension_numbers = #tpu.dot_dimension_numbers<[1], [0], [0], [1], [0, 0, 1, 1], [], []>} : vector<8x32xbf16>, vector<32x128xbf16>, vector<8x128xf32> -> vector<8x128xf32>
    %369 = arith.addf %366, %368 : vector<8x128xf32>
    %370 = vector.broadcast %3 : vector<1x128xf32> to vector<8x128xf32>
    %371 = arith.addf %369, %370 : vector<8x128xf32>
    %372 = arith.negf %371 : vector<8x128xf32>
    %373 = math.exp %372 : vector<8x128xf32>
    %cst_87 = arith.constant 1.000000e+00 : f32
    %374 = vector.broadcast %cst_87 : f32 to vector<8x128xf32>
    %375 = arith.addf %374, %373 : vector<8x128xf32>
    %376 = arith.divf %374, %375 : vector<8x128xf32>
    %377 = math.tanh %371 : vector<8x128xf32>
    %378 = vector.extract_strided_slice %376 {offsets = [0, 0], sizes = [8, 32], strides = [1, 1]} : vector<8x128xf32> to vector<8x32xf32>
    %379 = vector.extract_strided_slice %376 {offsets = [0, 32], sizes = [8, 32], strides = [1, 1]} : vector<8x128xf32> to vector<8x32xf32>
    %380 = vector.extract_strided_slice %377 {offsets = [0, 64], sizes = [8, 32], strides = [1, 1]} : vector<8x128xf32> to vector<8x32xf32>
    %381 = vector.extract_strided_slice %376 {offsets = [0, 96], sizes = [8, 32], strides = [1, 1]} : vector<8x128xf32> to vector<8x32xf32>
    %382 = arith.mulf %379, %337 : vector<8x32xf32>
    %383 = arith.mulf %378, %380 : vector<8x32xf32>
    %384 = arith.addf %382, %383 : vector<8x32xf32>
    %385 = math.tanh %384 : vector<8x32xf32>
    %386 = arith.mulf %381, %385 : vector<8x32xf32>
    %387 = arith.index_cast %c7_i32 : i32 to index
    %c0_88 = arith.constant 0 : index
    %c0_89 = arith.constant 0 : index
    %388 = vector.load %arg12[%387, %c0_88, %c0_89] : memref<8x8x32xf32, #tpu.memory_space<vmem>>, vector<1x8x32xf32>
    %389 = vector.shape_cast %388 : vector<1x8x32xf32> to vector<8x32xf32>
    %390 = vector.shape_cast %386 : vector<8x32xf32> to vector<1x8x32xf32>
    tpu.vector_store %arg12[%387, %c0_88, %c0_89], %390 {strides = array<i32>} : memref<8x8x32xf32, #tpu.memory_space<vmem>>, vector<1x8x32xf32>,
    %c8_i32 = arith.constant 8 : i32
    %c0_90 = arith.constant 0 : index
    %c0_91 = arith.constant 0 : index
    %c0_92 = arith.constant 0 : index
    %391 = vector.load %arg12[%c0_90, %c0_91, %c0_92] : memref<8x8x32xf32, #tpu.memory_space<vmem>>, vector<8x8x32xf32>
    %392 = vector.shape_cast %391 : vector<8x8x32xf32> to vector<64x32xf32>
    %393 = arith.truncf %392 : vector<64x32xf32> to vector<64x32xbf16>
    %c0_93 = arith.constant 0 : index
    %c0_94 = arith.constant 0 : index
    %394 = vector.load %arg6[%c0_93, %c0_94] : memref<32x128xbf16, #tpu.memory_space<vmem>>, vector<32x128xbf16>
    %cst_95 = arith.constant dense<0.000000e+00> : vector<64x128xf32>
    %395 = tpu.matmul %393, %394, %cst_95 {dimension_numbers = #tpu.dot_dimension_numbers<[1], [0], [0], [1], [0, 0, 1, 1], [], []>} : vector<64x32xbf16>, vector<32x128xbf16>, vector<64x128xf32> -> vector<64x128xf32>
    %c0_96 = arith.constant 0 : index
    %c0_97 = arith.constant 0 : index
    %396 = vector.load %arg9[%c0_96, %c0_97] : memref<1x128xf32, #tpu.memory_space<vmem>>, vector<1x128xf32>
    %397 = vector.broadcast %396 : vector<1x128xf32> to vector<64x128xf32>
    %398 = arith.addf %395, %397 : vector<64x128xf32>
    %399 = vector.extract_strided_slice %398 {offsets = [0, 0], sizes = [8, 128], strides = [1, 1]} : vector<64x128xf32> to vector<8x128xf32>
    %c0_98 = arith.constant 0 : index
    %c0_99 = arith.constant 0 : index
    %c0_100 = arith.constant 0 : index
    %400 = vector.load %arg10[%c0_98, %c0_99, %c0_100] : memref<8x8x128xf32, #tpu.memory_space<vmem>>, vector<8x1x128xf32>
    %401 = vector.shape_cast %400 : vector<8x1x128xf32> to vector<8x128xf32>
    %402 = vector.shape_cast %399 : vector<8x128xf32> to vector<8x1x128xf32>
    tpu.vector_store %arg10[%c0_98, %c0_99, %c0_100], %402 {strides = array<i32>} : memref<8x8x128xf32, #tpu.memory_space<vmem>>, vector<8x1x128xf32>,
    %403 = vector.extract_strided_slice %398 {offsets = [8, 0], sizes = [8, 128], strides = [1, 1]} : vector<64x128xf32> to vector<8x128xf32>
    %c0_101 = arith.constant 0 : index
    %c1 = arith.constant 1 : index
    %c0_102 = arith.constant 0 : index
    %404 = vector.load %arg10[%c0_101, %c1, %c0_102] : memref<8x8x128xf32, #tpu.memory_space<vmem>>, vector<8x1x128xf32>
    %405 = vector.shape_cast %404 : vector<8x1x128xf32> to vector<8x128xf32>
    %406 = vector.shape_cast %403 : vector<8x128xf32> to vector<8x1x128xf32>
    tpu.vector_store %arg10[%c0_101, %c1, %c0_102], %406 {strides = array<i32>} : memref<8x8x128xf32, #tpu.memory_space<vmem>>, vector<8x1x128xf32>,
    %407 = vector.extract_strided_slice %398 {offsets = [16, 0], sizes = [8, 128], strides = [1, 1]} : vector<64x128xf32> to vector<8x128xf32>
    %c0_103 = arith.constant 0 : index
    %c2 = arith.constant 2 : index
    %c0_104 = arith.constant 0 : index
    %408 = vector.load %arg10[%c0_103, %c2, %c0_104] : memref<8x8x128xf32, #tpu.memory_space<vmem>>, vector<8x1x128xf32>
    %409 = vector.shape_cast %408 : vector<8x1x128xf32> to vector<8x128xf32>
    %410 = vector.shape_cast %407 : vector<8x128xf32> to vector<8x1x128xf32>
    tpu.vector_store %arg10[%c0_103, %c2, %c0_104], %410 {strides = array<i32>} : memref<8x8x128xf32, #tpu.memory_space<vmem>>, vector<8x1x128xf32>,
    %411 = vector.extract_strided_slice %398 {offsets = [24, 0], sizes = [8, 128], strides = [1, 1]} : vector<64x128xf32> to vector<8x128xf32>
    %c0_105 = arith.constant 0 : index
    %c3 = arith.constant 3 : index
    %c0_106 = arith.constant 0 : index
    %412 = vector.load %arg10[%c0_105, %c3, %c0_106] : memref<8x8x128xf32, #tpu.memory_space<vmem>>, vector<8x1x128xf32>
    %413 = vector.shape_cast %412 : vector<8x1x128xf32> to vector<8x128xf32>
    %414 = vector.shape_cast %411 : vector<8x128xf32> to vector<8x1x128xf32>
    tpu.vector_store %arg10[%c0_105, %c3, %c0_106], %414 {strides = array<i32>} : memref<8x8x128xf32, #tpu.memory_space<vmem>>, vector<8x1x128xf32>,
    %415 = vector.extract_strided_slice %398 {offsets = [32, 0], sizes = [8, 128], strides = [1, 1]} : vector<64x128xf32> to vector<8x128xf32>
    %c0_107 = arith.constant 0 : index
    %c4 = arith.constant 4 : index
    %c0_108 = arith.constant 0 : index
    %416 = vector.load %arg10[%c0_107, %c4, %c0_108] : memref<8x8x128xf32, #tpu.memory_space<vmem>>, vector<8x1x128xf32>
    %417 = vector.shape_cast %416 : vector<8x1x128xf32> to vector<8x128xf32>
    %418 = vector.shape_cast %415 : vector<8x128xf32> to vector<8x1x128xf32>
    tpu.vector_store %arg10[%c0_107, %c4, %c0_108], %418 {strides = array<i32>} : memref<8x8x128xf32, #tpu.memory_space<vmem>>, vector<8x1x128xf32>,
    %419 = vector.extract_strided_slice %398 {offsets = [40, 0], sizes = [8, 128], strides = [1, 1]} : vector<64x128xf32> to vector<8x128xf32>
    %c0_109 = arith.constant 0 : index
    %c5 = arith.constant 5 : index
    %c0_110 = arith.constant 0 : index
    %420 = vector.load %arg10[%c0_109, %c5, %c0_110] : memref<8x8x128xf32, #tpu.memory_space<vmem>>, vector<8x1x128xf32>
    %421 = vector.shape_cast %420 : vector<8x1x128xf32> to vector<8x128xf32>
    %422 = vector.shape_cast %419 : vector<8x128xf32> to vector<8x1x128xf32>
    tpu.vector_store %arg10[%c0_109, %c5, %c0_110], %422 {strides = array<i32>} : memref<8x8x128xf32, #tpu.memory_space<vmem>>, vector<8x1x128xf32>,
    %423 = vector.extract_strided_slice %398 {offsets = [48, 0], sizes = [8, 128], strides = [1, 1]} : vector<64x128xf32> to vector<8x128xf32>
    %c0_111 = arith.constant 0 : index
    %c6 = arith.constant 6 : index
    %c0_112 = arith.constant 0 : index
    %424 = vector.load %arg10[%c0_111, %c6, %c0_112] : memref<8x8x128xf32, #tpu.memory_space<vmem>>, vector<8x1x128xf32>
    %425 = vector.shape_cast %424 : vector<8x1x128xf32> to vector<8x128xf32>
    %426 = vector.shape_cast %423 : vector<8x128xf32> to vector<8x1x128xf32>
    tpu.vector_store %arg10[%c0_111, %c6, %c0_112], %426 {strides = array<i32>} : memref<8x8x128xf32, #tpu.memory_space<vmem>>, vector<8x1x128xf32>,
    %427 = vector.extract_strided_slice %398 {offsets = [56, 0], sizes = [8, 128], strides = [1, 1]} : vector<64x128xf32> to vector<8x128xf32>
    %c0_113 = arith.constant 0 : index
    %c7 = arith.constant 7 : index
    %c0_114 = arith.constant 0 : index
    %428 = vector.load %arg10[%c0_113, %c7, %c0_114] : memref<8x8x128xf32, #tpu.memory_space<vmem>>, vector<8x1x128xf32>
    %429 = vector.shape_cast %428 : vector<8x1x128xf32> to vector<8x128xf32>
    %430 = vector.shape_cast %427 : vector<8x128xf32> to vector<8x1x128xf32>
    tpu.vector_store %arg10[%c0_113, %c7, %c0_114], %430 {strides = array<i32>} : memref<8x8x128xf32, #tpu.memory_space<vmem>>, vector<8x1x128xf32>,
    return
  }
  func.func @transform_0(%arg0: i32) -> (i32, i32, i32) {
    %c0_i32 = arith.constant 0 : i32
    %c0_i32_0 = arith.constant 0 : i32
    %c0_i32_1 = arith.constant 0 : i32
    return %c0_i32, %arg0, %c0_i32_0 : i32, i32, i32
  }
  func.func @transform_1(%arg0: i32) -> (i32, i32) {
    %c0_i32 = arith.constant 0 : i32
    %c0_i32_0 = arith.constant 0 : i32
    %c0_i32_1 = arith.constant 0 : i32
    return %c0_i32, %c0_i32_0 : i32, i32
  }
  func.func @transform_2(%arg0: i32) -> (i32, i32) {
    %c0_i32 = arith.constant 0 : i32
    %c0_i32_0 = arith.constant 0 : i32
    %c0_i32_1 = arith.constant 0 : i32
    return %c0_i32, %c0_i32_0 : i32, i32
  }
  func.func @transform_3(%arg0: i32) -> (i32, i32) {
    %c0_i32 = arith.constant 0 : i32
    %c0_i32_0 = arith.constant 0 : i32
    %c0_i32_1 = arith.constant 0 : i32
    return %c0_i32, %c0_i32_0 : i32, i32
  }
  func.func @transform_4(%arg0: i32) -> (i32, i32) {
    %c0_i32 = arith.constant 0 : i32
    %c0_i32_0 = arith.constant 0 : i32
    %c0_i32_1 = arith.constant 0 : i32
    return %c0_i32, %c0_i32_0 : i32, i32
  }
  func.func @transform_5(%arg0: i32) -> (i32, i32) {
    %c0_i32 = arith.constant 0 : i32
    %c0_i32_0 = arith.constant 0 : i32
    %c0_i32_1 = arith.constant 0 : i32
    return %c0_i32, %c0_i32_0 : i32, i32
  }
  func.func @transform_6(%arg0: i32) -> (i32, i32) {
    %c0_i32 = arith.constant 0 : i32
    %c0_i32_0 = arith.constant 0 : i32
    %c0_i32_1 = arith.constant 0 : i32
    return %c0_i32, %c0_i32_0 : i32, i32
  }
  func.func @transform_7(%arg0: i32) -> (i32, i32) {
    %c0_i32 = arith.constant 0 : i32
    %c0_i32_0 = arith.constant 0 : i32
    %c0_i32_1 = arith.constant 0 : i32
    return %c0_i32, %c0_i32_0 : i32, i32
  }
  func.func @transform_8(%arg0: i32) -> (i32, i32) {
    %c0_i32 = arith.constant 0 : i32
    %c0_i32_0 = arith.constant 0 : i32
    %c0_i32_1 = arith.constant 0 : i32
    return %c0_i32, %c0_i32_0 : i32, i32
  }
  func.func @transform_9(%arg0: i32) -> (i32, i32, i32) {
    %c0_i32 = arith.constant 0 : i32
    %c0_i32_0 = arith.constant 0 : i32
    %c0_i32_1 = arith.constant 0 : i32
    return %arg0, %c0_i32, %c0_i32_0 : i32, i32, i32
  }
}

</mosaic_0001>

<bundles_post_ra>
// kernel: decoder_rnn_forward.1
= control target key start
LH: loop header
LB: loop body
LE: loop exit
PB: predicated region body
PF: predicated region fallthrough
CT: control target
= control target key end

     0   :  { %v2991_v2 = vmov 0.0   ;;  %vm2992_vm0 = vmmov 0   ;;  %vm98_vm1 = vcmask 523264   ;;  %s3591_s0 = inlined_call_operand.vmem [shape: f32[8,8,64], index: 0, kind: input, shape index: {}]   ;;  %s3592_s1 = inlined_call_operand.vmem [shape: bf16[64,128], index: 1, kind: input, shape index: {}]   ;;  %s3593_s2 = inlined_call_operand.vmem [shape: bf16[32,128], index: 2, kind: input, shape index: {}]   ;;  %s3594_s3 = inlined_call_operand.vmem [shape: bf16[32,128], index: 3, kind: input, shape index: {}]   ;;  %s3595_s4 = inlined_call_operand.vmem [shape: bf16[32,128], index: 4, kind: input, shape index: {}]   ;;  %s3596_s5 = inlined_call_operand.vmem [shape: bf16[32,128], index: 5, kind: input, shape index: {}]   ;;  %s3597_s6 = inlined_call_operand.vmem [shape: f32[1,128], index: 6, kind: input, shape index: {}]   ;;  %s3598_s7 = inlined_call_operand.vmem [shape: f32[1,128], index: 7, kind: input, shape index: {}]   ;;  %s3599_s8 = inlined_call_operand.vmem [shape: f32[1,128], index: 8, kind: input, shape index: {}]   ;;  %s3600_s9 = inlined_call_operand.hbm [shape: f32[8,8,128], index: 9, kind: output, shape index: {}]  }
   0x1   :  { %v2821_v0 = vld [vmem:[%s3592_s1] sm:$0xff]   ;;  %v2822_v1 = vld [vmem:[%s3592_s1 + $0x8] sm:$0xff]   ;;  %2608 = vmatprep.subr.bf16.mxu1 %v2991_v2  ;;  %2612 = vmatprep.mubr.msk.bf16.mxu1 %vm2992_vm0, %v2991_v2  ;;  %v2823_v4 = vld [vmem:[%s3592_s1 + $0x10] sm:$0xff]  }
   0x2   :  { %2592 = vmatprep.subr.bf16.mxu0 %v2821_v0  ;;  %v3060_v3 = vld [vmem:[%s3593_s2] sm:$0xff]   ;;  %v3071_v5 = vld [vmem:[%s3593_s2 + $0x8] sm:$0xff]   ;;  %v2825_v8 = vld [vmem:[%s3592_s1 + $0x18] sm:$0xff]  }
   0x3   :  { %2593 = vmatpush3.bf16.msra.mxu0 %v2821_v0  ;;  %2609 = vmatpush3.bf16.msra.mxu1 %v3060_v3  ;;  %v47_v6 = vld [vmem:[%s3591_s0] sm:$0xff]  ;;  %v48_v7 = vld [vmem:[%s3591_s0 + $0x8] sm:$0xff]  ;;  %v49_v10 = vld [vmem:[%s3591_s0 + $0x10] sm:$0xff] }
   0x4   :  { %2594 = vmatprep.subr.bf16.mxu0 %v2822_v1  ;;  %2610 = vmatprep.subr.bf16.mxu1 %v2991_v2  ;;  %v55_v9 = vpack.c.bf16 %v48_v7, %v47_v6  ;;  %v50_v11 = vld [vmem:[%s3591_s0 + $0x18] sm:$0xff] }
   0x6   :  { %2600 = vmatprep.mubr.msk.bf16.mxu0 %vm98_vm1, %v55_v9 }
   0x7   :  { %2595 = vmatpush3.bf16.msra.mxu0 %v2822_v1  ;;  %2611 = vmatpush3.bf16.msra.mxu1 %v3071_v5 }
   0x8   :  { %2596 = vmatprep.subr.bf16.mxu0 %v2823_v4  ;;  %2616 = vmatprep.subr.bf16.mxu1 %v2991_v2 }
   0xb   :  { %2597 = vmatpush3.bf16.msra.mxu0 %v2823_v4 }
   0xc   :  { %14 = vsyncpa [#allocation5], 0  ;;  %2598 = vmatprep.subr.bf16.mxu0 %v2825_v8  ;;  %v2993_v12 = vmov 0   ;;  %v56_v13 = vpack.c.bf16 %v50_v11, %v49_v10  ;;  %v3103_v18 = vld [vmem:[%s3597_s6] ss:$0 sm:$0xff]  ;;  %s2994_s30 = smov 64  }
   0xd   :  { %2613 = vmatmul.mubr.bf16.vlgmr.msra.gmra.mrb[0].mxu1 %v2993_v12  ;;  %s2995_s10 = smov 32   ;;  %v3120_v35 = vld [vmem:[%s3595_s4] sm:$0xff]   ;;  %v52_v37 = vld [vmem:[%s3591_s0 + $0x28] sm:$0xff]  ;;  %v53_v38 = vld [vmem:[%s3591_s0 + $0x30] sm:$0xff]  ;;  %vm197_vm2 = vcmask 261120  }
   0xe   :  { %2620 = vmatprep.mubr.msk.bf16.mxu1 %vm2992_vm0, %v2991_v2  ;;  %v51_v36 = vld [vmem:[%s3591_s0 + $0x20] sm:$0xff]  ;;  %v54_v39 = vld [vmem:[%s3591_s0 + $0x38] sm:$0xff]  ;;  %2617 = vmatpush3.bf16.msra.mxu1 %v3120_v35  ;;  %v3138_v40 = vld [vmem:[%s3595_s4 + $0x8] sm:$0xff]  }
   0xf   :  { %2599 = vmatpush3.bf16.msra.mxu0 %v2825_v8  ;;  %v57_v41 = vpack.c.bf16 %v52_v37, %v51_v36  ;;  %v58_v42 = vpack.c.bf16 %v54_v39, %v53_v38  ;;  %2618 = vmatprep.subr.bf16.mxu1 %v2991_v2  ;;  %v3147_v43 = vld [vmem:[%s3594_s3] sm:$0xff]   ;;  %v3157_v45 = vld [vmem:[%s3594_s3 + $0x8] sm:$0xff]  }
  0x10   :  { %2632 = vmatprep.subr.bf16.mxu0 %v2991_v2  ;;  %v3192_v59 = vld [vmem:[%s3598_s7] ss:$0 sm:$0xff] }
  0x12   :  { %2601 = vmatmul.mubr.msk.bf16.vlgmr.msra.gmra.mrb[0].mxu0 %vm98_vm1, %v56_v13  ;;  %2619 = vmatpush3.bf16.msra.mxu1 %v3138_v40 }
  0x13   :  { %2633 = vmatpush3.bf16.msra.mxu0 %v3060_v3  ;;  %2604 = vmatprep.mubr.msk.bf16.mxu0 %vm98_vm1, %v57_v41 }
  0x14   :  { %2634 = vmatprep.subr.bf16.mxu0 %v2991_v2  ;;  %2624 = vmatprep.subr.bf16.mxu1 %v2991_v2 }
  0x15   :  { %2621 = vmatmul.mubr.bf16.vlgmr.msra.gmra.mrb[4].mxu1 %v2993_v12 }
  0x16   :  { %2625 = vmatpush3.bf16.msra.mxu1 %v3147_v43  ;;  %2628 = vmatprep.mubr.msk.bf16.mxu1 %vm2992_vm0, %v2991_v2 }
  0x17   :  { %2635 = vmatpush3.bf16.msra.mxu0 %v3071_v5  ;;  %2626 = vmatprep.subr.bf16.mxu1 %v2991_v2 }
  0x18   :  { %2648 = vmatprep.subr.bf16.mxu0 %v2991_v2 }
  0x1a   :  { %2605 = vmatmul.mubr.msk.bf16.gmra.mrb[4].mxu0 %vm98_vm1, %v58_v42  ;;  %2627 = vmatpush3.bf16.msra.mxu1 %v3157_v45 }
  0x1b   :  { %2636 = vmatprep.mubr.msk.bf16.mxu0 %vm2992_vm0, %v2991_v2  ;;  %2640 = vmatprep.subr.bf16.mxu1 %v2991_v2 }
  0xe0   :  { %v235_v14 = vpop.f32.mrb[0].mxu1 }
  0xe1   :  { %v2614_v15 = vpop.f32.mrb[1].mxu1 }
  0xe2   :  { %v238_v16 = vpop.f32.mrb[2].mxu1 }
  0xe3   :  { %v2615_v17 = vpop.f32.mrb[3].mxu1 }
  0xe5   :  { %v3105_v19 = vpop.f32.mrb[0].mxu0 }
  0xe6   :  { %v145_v20 = vpop.f32.mrb[1].mxu0 }
  0xe7   :  { %v146_v21 = vadd.f32 %v3103_v18, %v145_v20  ;;  %v3108_v22 = vpop.f32.mrb[2].mxu0 }
  0xe8   :  { %v3110_v23 = vpop.f32.mrb[3].mxu0  ;;  %v313_v53 = vpop.f32.mrb[4].mxu1 }
  0xe9   :  { %v241_v24 = vadd.f32 %v235_v14, %v146_v21  ;;  %v2622_v54 = vpop.f32.mrb[5].mxu1  ;;  %v149_v58 = vadd.f32 %v3103_v18, %v3110_v23 }
  0xea   :  { %v316_v55 = vpop.f32.mrb[6].mxu1 }
  0xeb   :  { %2833 = vtanh.f32 %v241_v24  ;;  %v2424_v26 = vmul.f32 -1.442695, %v241_v24  ;;  %v2623_v56 = vpop.f32.mrb[7].mxu1 }
  0xed   :  { %2835 = vpow2.f32 %v2424_v26  ;;  %v3165_v49 = vpop.f32.mrb[4].mxu0 }
  0xee   :  { %v3167_v50 = vpop.f32.mrb[5].mxu0 }
  0xef   :  { %v3169_v51 = vpop.f32.mrb[6].mxu0 }
  0xf0   :  { %v3171_v52 = vpop.f32.mrb[7].mxu0 }
  0xf5   :  { %v2834_v25 = vpop.eup %2833 }
  0xf6   :  { %251 = vrot.lane.b32.xlu0 %v2834_v25, %s2994_s30 }
  0xf7   :  { %v2836_v27 = vpop.eup %2835 }
  0xf8   :  { %v245_v28 = vadd.f32 1.0, %v2836_v27 }
  0xfa   :  { %2837 = vrcp.f32 %v245_v28 }
 0x104   :  { %v2838_v29 = vpop.eup %2837 }
 0x105   :  { %v249_v32 = vmul.f32 0.0, %v2838_v29 }
 0x168   :  { %v252_v30 = vpop.permute.xlu0 %251 }
 0x169   :  { %v254_v31 = vmul.f32 %v2838_v29, %v252_v30 }
 0x16b   :  { %256 = vrot.lane.b32.xlu0 %v254_v31, %s2995_s10 }
 0x1dd   :  { %v257_v33 = vpop.permute.xlu0 %256 }
 0x1de   :  { %v3114_v34 = vadd.f32 %v257_v33, %v249_v32 }
 0x1e0   :  { %2839 = vtanh.f32 %v3114_v34 }
 0x1ea   :  { %v2840_v44 = vpop.eup %2839 }
 0x1eb   :  { %262 = vrot.lane.b32.xlu1 %v2840_v44, %s2994_s30 }
 0x25d   :  { %v263_v46 = vpop.permute.xlu1 %262 }
 0x25e   :  { %v265_v47 = vmul.f32 %v2838_v29, %v263_v46 }
 0x260   :  { %v266_v48 = vpack.c.bf16 %v265_v47, %v265_v47 }
 0x262   :  { %320 = vrot.lane.b32.xlu1 %v266_v48, %s2995_s10 }
 0x2d4   :  { %v321_v57 = vpop.permute.xlu1 %320 }
 0x2d5   :  { %2629 = vmatmul.mubr.msk.bf16.vlgmr.msra.gmra.mrb[8].mxu1 %vm197_vm2, %v321_v57  ;;  %2637 = vmatmul.mubr.msk.bf16.vlgmr.msra.gmra.mrb[8].mxu0 %vm197_vm2, %v321_v57 }
 0x2d6   :  { %2649 = vmatpush3.bf16.msra.mxu0 %v3147_v43  ;;  %2641 = vmatpush3.bf16.msra.mxu1 %v3120_v35 }
 0x2d7   :  { %2650 = vmatprep.subr.bf16.mxu0 %v2991_v2  ;;  %2642 = vmatprep.subr.bf16.mxu1 %v2991_v2 }
 0x2d8   :  { %2652 = vmatprep.mubr.msk.bf16.mxu0 %vm2992_vm0, %v2991_v2  ;;  %2644 = vmatprep.mubr.msk.bf16.mxu1 %vm2992_vm0, %v2991_v2 }
 0x2da   :  { %2651 = vmatpush3.bf16.msra.mxu0 %v3157_v45  ;;  %2643 = vmatpush3.bf16.msra.mxu1 %v3138_v40 }
 0x2db   :  { %2656 = vmatprep.subr.bf16.mxu1 %v2991_v2  ;;  %2664 = vmatprep.subr.bf16.mxu0 %v2991_v2 }
 0x3a8   :  { %v371_v60 = vpop.f32.mrb[8].mxu1  ;;  %v449_v61 = vpop.f32.mrb[8].mxu0 }
 0x3a9   :  { %v372_v62 = vadd.f32 %v371_v60, %v313_v53  ;;  %v455_v63 = vadd.f32 %v449_v61, %v149_v58  ;;  %v2630_v0 = vpop.f32.mrb[9].mxu1  ;;  %v2638_v1 = vpop.f32.mrb[9].mxu0 }
 0x3aa   :  { %v374_v4 = vpop.f32.mrb[10].mxu1  ;;  %v452_v6 = vpop.f32.mrb[10].mxu0 }
 0x3ab   :  { %v383_v7 = vadd.f32 %v3192_v59, %v372_v62  ;;  %2841 = vtanh.f32 %v455_v63  ;;  %v2631_v8 = vpop.f32.mrb[11].mxu1  ;;  %v2639_v9 = vpop.f32.mrb[11].mxu0  ;;  %v2433_v12 = vmul.f32 -1.442695, %v455_v63  ;;  %v154_v62 = vadd.f32 %v3105_v19, %v3103_v18 }
 0x3ad   :  { %2843 = vtanh.f32 %v383_v7  ;;  %v2431_v13 = vmul.f32 -1.442695, %v383_v7 }
 0x3ae   :  { %2845 = vpow2.f32 %v2433_v12 }
 0x3af   :  { %2847 = vpow2.f32 %v2431_v13 }
 0x3b5   :  { %v2842_v10 = vpop.eup %2841 }
 0x3b6   :  { %465 = vrot.lane.b32.xlu1 %v2842_v10, %s2994_s30 }
 0x3b7   :  { %v2844_v11 = vpop.eup %2843 }
 0x3b8   :  { %393 = vrot.lane.b32.xlu0 %v2844_v11, %s2994_s30  ;;  %v2846_v14 = vpop.eup %2845 }
 0x3b9   :  { %v2848_v15 = vpop.eup %2847  ;;  %v459_v16 = vadd.f32 1.0, %v2846_v14 }
 0x3ba   :  { %v387_v17 = vadd.f32 1.0, %v2848_v15 }
 0x3bb   :  { %2849 = vrcp.f32 %v459_v16 }
 0x3bc   :  { %2851 = vrcp.f32 %v387_v17 }
 0x3c5   :  { %v2850_v20 = vpop.eup %2849 }
 0x3c6   :  { %v2852_v24 = vpop.eup %2851  ;;  %v463_v27 = vmul.f32 %v2850_v20, %v3114_v34 }
 0x3c7   :  { %v391_v30 = vmul.f32 0.0, %v2852_v24 }
 0x428   :  { %v466_v21 = vpop.permute.xlu1 %465 }
 0x429   :  { %v468_v23 = vmul.f32 %v2850_v20, %v466_v21 }
 0x42a   :  { %v394_v25 = vpop.permute.xlu0 %393 }
 0x42b   :  { %v396_v26 = vmul.f32 %v2852_v24, %v394_v25  ;;  %470 = vrot.lane.b32.xlu1 %v468_v23, %s2995_s10 }
 0x42d   :  { %398 = vrot.lane.b32.xlu0 %v396_v26, %s2995_s10 }
 0x49d   :  { %v471_v28 = vpop.permute.xlu1 %470 }
 0x49e   :  { %v3200_v29 = vadd.f32 %v471_v28, %v463_v27 }
 0x49f   :  { %v399_v31 = vpop.permute.xlu0 %398 }
 0x4a0   :  { %2853 = vtanh.f32 %v3200_v29  ;;  %v3203_v32 = vadd.f32 %v399_v31, %v391_v30 }
 0x4a2   :  { %2855 = vtanh.f32 %v3203_v32 }
 0x4aa   :  { %v2854_v33 = vpop.eup %2853 }
 0x4ab   :  { %476 = vrot.lane.b32.xlu1 %v2854_v33, %s2994_s30 }
 0x4ac   :  { %v2856_v36 = vpop.eup %2855 }
 0x4ad   :  { %404 = vrot.lane.b32.xlu0 %v2856_v36, %s2994_s30 }
 0x51d   :  { %v477_v37 = vpop.permute.xlu1 %476 }
 0x51e   :  { %v479_v38 = vmul.f32 %v2850_v20, %v477_v37 }
 0x51f   :  { %v405_v34 = vpop.permute.xlu0 %404 }
 0x520   :  { %v480_v39 = vpack.c.bf16 %v479_v38, %v479_v38  ;;  %v3208_v41 = vmul.f32 %v2852_v24, %v405_v34 }
 0x522   :  { %v481_v42 = vpack.c.bf16 %v3208_v41, %v3208_v41  ;;  %529 = vrot.lane.b32.xlu1 %v480_v39, %s2995_s10 }
 0x524   :  { %483 = vrot.lane.b32.xlu0 %v481_v42, %s2995_s10 }
 0x594   :  { %v530_v44 = vpop.permute.xlu1 %529 }
 0x595   :  { %2653 = vmatmul.mubr.msk.bf16.vlgmr.msra.gmra.mrb[12].mxu0 %vm197_vm2, %v530_v44 }
 0x596   :  { %v484_v46 = vpop.permute.xlu0 %483  ;;  %2665 = vmatpush3.bf16.msra.mxu0 %v3120_v35  ;;  %2668 = vmatprep.mubr.msk.bf16.mxu0 %vm2992_vm0, %v2991_v2 }
 0x597   :  { %2645 = vmatmul.mubr.msk.bf16.vlgmr.msra.gmra.mrb[12].mxu1 %vm197_vm2, %v484_v46  ;;  %2666 = vmatprep.subr.bf16.mxu0 %v2991_v2 }
 0x598   :  { %2657 = vmatpush3.bf16.msra.mxu1 %v3060_v3  ;;  %2660 = vmatprep.mubr.msk.bf16.mxu1 %vm2992_vm0, %v2991_v2 }
 0x599   :  { %2658 = vmatprep.subr.bf16.mxu1 %v2991_v2 }
 0x59a   :  { %2667 = vmatpush3.bf16.msra.mxu0 %v3138_v40 }
 0x59b   :  { %2680 = vmatprep.subr.bf16.mxu0 %v2991_v2 }
 0x59c   :  { %2659 = vmatpush3.bf16.msra.mxu1 %v3071_v5 }
 0x59d   :  { %2672 = vmatprep.subr.bf16.mxu1 %v2991_v2 }
 0x59f   :  { %2661 = vmatmul.mubr.msk.bf16.vlgmr.msra.gmra.mrb[16].mxu1 %vm197_vm2, %v530_v44 }
 0x5a0   :  { %2673 = vmatpush3.bf16.msra.mxu1 %v3147_v43  ;;  %2676 = vmatprep.mubr.msk.bf16.mxu1 %vm2992_vm0, %v2991_v2 }
 0x5a1   :  { %2674 = vmatprep.subr.bf16.mxu1 %v2991_v2 }
 0x5a4   :  { %2675 = vmatpush3.bf16.msra.mxu1 %v3157_v45 }
 0x5a5   :  { %2688 = vmatprep.subr.bf16.mxu1 %v2991_v2 }
 0x668   :  { %v568_v47 = vpop.f32.mrb[12].mxu0 }
 0x669   :  { %v2654_v48 = vpop.f32.mrb[13].mxu0 }
 0x66a   :  { %v522_v53 = vpop.f32.mrb[12].mxu1  ;;  %v571_v54 = vpop.f32.mrb[14].mxu0 }
 0x66b   :  { %v569_v55 = vadd.f32 %v568_v47, %v522_v53  ;;  %v2646_v56 = vpop.f32.mrb[13].mxu1  ;;  %v2655_v57 = vpop.f32.mrb[15].mxu0  ;;  %v157_v53 = vadd.f32 %v3108_v22, %v3103_v18 }
 0x66c   :  { %v525_v58 = vpop.f32.mrb[14].mxu1 }
 0x66d   :  { %v574_v60 = vadd.f32 %v3192_v59, %v569_v55  ;;  %v2647_v61 = vpop.f32.mrb[15].mxu1 }
 0x66f   :  { %2857 = vtanh.f32 %v574_v60  ;;  %v2436_v9 = vmul.f32 -1.442695, %v574_v60 }
 0x672   :  { %v641_v63 = vpop.f32.mrb[16].mxu1 }
 0x673   :  { %v647_v0 = vadd.f32 %v641_v63, %v154_v62  ;;  %v2662_v1 = vpop.f32.mrb[17].mxu1 }
 0x674   :  { %v644_v4 = vpop.f32.mrb[18].mxu1 }
 0x675   :  { %2859 = vtanh.f32 %v647_v0  ;;  %v2663_v6 = vpop.f32.mrb[19].mxu1  ;;  %v2438_v10 = vmul.f32 -1.442695, %v647_v0 }
 0x676   :  { %2861 = vpow2.f32 %v2436_v9 }
 0x677   :  { %2863 = vpow2.f32 %v2438_v10 }
 0x679   :  { %v2858_v7 = vpop.eup %2857 }
 0x67a   :  { %584 = vrot.lane.b32.xlu0 %v2858_v7, %s2994_s30 }
 0x67f   :  { %v2860_v8 = vpop.eup %2859 }
 0x680   :  { %657 = vrot.lane.b32.xlu1 %v2860_v8, %s2994_s30  ;;  %v2862_v11 = vpop.eup %2861 }
 0x681   :  { %v578_v12 = vadd.f32 1.0, %v2862_v11  ;;  %v2864_v13 = vpop.eup %2863 }
 0x682   :  { %v651_v19 = vadd.f32 1.0, %v2864_v13 }
 0x683   :  { %2865 = vrcp.f32 %v578_v12 }
 0x684   :  { %2867 = vrcp.f32 %v651_v19 }
 0x68d   :  { %v2866_v14 = vpop.eup %2865 }
 0x68e   :  { %v2868_v17 = vpop.eup %2867  ;;  %v582_v23 = vmul.f32 %v2866_v14, %v3203_v32 }
 0x68f   :  { %v655_v26 = vmul.f32 %v2868_v17, %v3200_v29 }
 0x6ec   :  { %v585_v15 = vpop.permute.xlu0 %584 }
 0x6ed   :  { %v587_v16 = vmul.f32 %v2866_v14, %v585_v15 }
 0x6ef   :  { %589 = vrot.lane.b32.xlu0 %v587_v16, %s2995_s10 }
 0x6f2   :  { %v658_v20 = vpop.permute.xlu1 %657 }
 0x6f3   :  { %v660_v21 = vmul.f32 %v2868_v17, %v658_v20 }
 0x6f5   :  { %662 = vrot.lane.b32.xlu1 %v660_v21, %s2995_s10 }
 0x761   :  { %v590_v24 = vpop.permute.xlu0 %589 }
 0x762   :  { %v3243_v25 = vadd.f32 %v590_v24, %v582_v23 }
 0x764   :  { %2869 = vtanh.f32 %v3243_v25 }
 0x767   :  { %v663_v27 = vpop.permute.xlu1 %662 }
 0x768   :  { %v3247_v28 = vadd.f32 %v663_v27, %v655_v26 }
 0x76a   :  { %2871 = vtanh.f32 %v3247_v28 }
 0x76e   :  { %v2870_v30 = vpop.eup %2869 }
 0x76f   :  { %595 = vrot.lane.b32.xlu0 %v2870_v30, %s2994_s30 }
 0x774   :  { %v2872_v31 = vpop.eup %2871 }
 0x775   :  { %668 = vrot.lane.b32.xlu1 %v2872_v31, %s2994_s30 }
 0x7e1   :  { %v596_v33 = vpop.permute.xlu0 %595 }
 0x7e2   :  { %v3252_v32 = vmul.f32 %v2866_v14, %v596_v33 }
 0x7e4   :  { %v673_v36 = vpack.c.bf16 %v3252_v32, %v3252_v32 }
 0x7e6   :  { %675 = vrot.lane.b32.xlu0 %v673_v36, %s2995_s10 }
 0x7e7   :  { %v669_v29 = vpop.permute.xlu1 %668 }
 0x7e8   :  { %v671_v37 = vmul.f32 %v2868_v17, %v669_v29 }
 0x7ea   :  { %v672_v38 = vpack.c.bf16 %v671_v37, %v671_v37 }
 0x7ec   :  { %721 = vrot.lane.b32.xlu1 %v672_v38, %s2995_s10 }
 0x858   :  { %v676_v34 = vpop.permute.xlu0 %675 }
 0x859   :  { %2669 = vmatmul.mubr.msk.bf16.vlgmr.msra.gmra.mrb[16].mxu0 %vm197_vm2, %v676_v34 }
 0x85a   :  { %2681 = vmatpush3.bf16.msra.mxu0 %v3060_v3  ;;  %2684 = vmatprep.mubr.msk.bf16.mxu0 %vm2992_vm0, %v2991_v2 }
 0x85b   :  { %2682 = vmatprep.subr.bf16.mxu0 %v2991_v2 }
 0x85e   :  { %2683 = vmatpush3.bf16.msra.mxu0 %v3071_v5  ;;  %v722_v39 = vpop.permute.xlu1 %721 }
 0x85f   :  { %2677 = vmatmul.mubr.msk.bf16.vlgmr.msra.gmra.mrb[20].mxu1 %vm197_vm2, %v722_v39  ;;  %2696 = vmatprep.subr.bf16.mxu0 %v2991_v2 }
 0x860   :  { %2689 = vmatpush3.bf16.msra.mxu1 %v3120_v35  ;;  %2692 = vmatprep.mubr.msk.bf16.mxu1 %vm2992_vm0, %v2991_v2 }
 0x861   :  { %2685 = vmatmul.mubr.msk.bf16.vlgmr.msra.gmra.mrb[20].mxu0 %vm197_vm2, %v722_v39  ;;  %2690 = vmatprep.subr.bf16.mxu1 %v2991_v2 }
 0x862   :  { %2697 = vmatpush3.bf16.msra.mxu0 %v3147_v43  ;;  %2700 = vmatprep.mubr.msk.bf16.mxu0 %vm2992_vm0, %v2991_v2 }
 0x863   :  { %2698 = vmatprep.subr.bf16.mxu0 %v2991_v2 }
 0x864   :  { %2691 = vmatpush3.bf16.msra.mxu1 %v3138_v40 }
 0x865   :  { %2704 = vmatprep.subr.bf16.mxu1 %v2991_v2 }
 0x866   :  { %2699 = vmatpush3.bf16.msra.mxu0 %v3157_v45 }
 0x867   :  { %2712 = vmatprep.subr.bf16.mxu0 %v2991_v2 }
 0x92c   :  { %v714_v42 = vpop.f32.mrb[16].mxu0 }
 0x92d   :  { %v2670_v44 = vpop.f32.mrb[17].mxu0 }
 0x92e   :  { %v717_v46 = vpop.f32.mrb[18].mxu0 }
 0x92f   :  { %v2671_v47 = vpop.f32.mrb[19].mxu0 }
 0x932   :  { %v760_v48 = vpop.f32.mrb[20].mxu1 }
 0x933   :  { %v761_v54 = vadd.f32 %v760_v48, %v714_v42  ;;  %v2678_v55 = vpop.f32.mrb[21].mxu1 }
 0x934   :  { %v763_v56 = vpop.f32.mrb[22].mxu1  ;;  %v833_v57 = vpop.f32.mrb[20].mxu0  ;;  %v162_v55 = vadd.f32 %v3103_v18, %v3167_v50 }
 0x935   :  { %v766_v58 = vadd.f32 %v3192_v59, %v761_v54  ;;  %v839_v60 = vadd.f32 %v833_v57, %v157_v53  ;;  %v2679_v61 = vpop.f32.mrb[23].mxu1  ;;  %v2686_v62 = vpop.f32.mrb[21].mxu0 }
 0x936   :  { %v836_v63 = vpop.f32.mrb[22].mxu0 }
 0x937   :  { %2873 = vtanh.f32 %v766_v58  ;;  %v2687_v0 = vpop.f32.mrb[23].mxu0  ;;  %v2441_v22 = vmul.f32 -1.442695, %v766_v58  ;;  %v2443_v6 = vmul.f32 -1.442695, %v839_v60 }
 0x938   :  { %2875 = vtanh.f32 %v839_v60 }
 0x939   :  { %2877 = vpow2.f32 %v2441_v22 }
 0x93a   :  { %2879 = vpow2.f32 %v2443_v6 }
 0x941   :  { %v2874_v1 = vpop.eup %2873 }
 0x942   :  { %v2876_v4 = vpop.eup %2875  ;;  %776 = vrot.lane.b32.xlu0 %v2874_v1, %s2994_s30 }
 0x943   :  { %849 = vrot.lane.b32.xlu1 %v2876_v4, %s2994_s30  ;;  %v2878_v7 = vpop.eup %2877 }
 0x944   :  { %v2880_v8 = vpop.eup %2879  ;;  %v770_v9 = vadd.f32 1.0, %v2878_v7 }
 0x945   :  { %v843_v10 = vadd.f32 1.0, %v2880_v8 }
 0x946   :  { %2881 = vrcp.f32 %v770_v9 }
 0x947   :  { %2883 = vrcp.f32 %v843_v10 }
 0x950   :  { %v2882_v11 = vpop.eup %2881 }
 0x951   :  { %v2884_v13 = vpop.eup %2883  ;;  %v774_v16 = vmul.f32 %v2882_v11, %v3243_v25 }
 0x952   :  { %v847_v17 = vmul.f32 %v2884_v13, %v3247_v28 }
 0x9b4   :  { %v777_v12 = vpop.permute.xlu0 %776 }
 0x9b5   :  { %v850_v19 = vpop.permute.xlu1 %849  ;;  %v779_v14 = vmul.f32 %v2882_v11, %v777_v12 }
 0x9b6   :  { %v852_v15 = vmul.f32 %v2884_v13, %v850_v19 }
 0x9b7   :  { %781 = vrot.lane.b32.xlu0 %v779_v14, %s2995_s10 }
 0x9b8   :  { %854 = vrot.lane.b32.xlu1 %v852_v15, %s2995_s10 }
 0xa29   :  { %v782_v20 = vpop.permute.xlu0 %781 }
 0xa2a   :  { %v855_v21 = vpop.permute.xlu1 %854  ;;  %v3288_v23 = vadd.f32 %v782_v20, %v774_v16 }
 0xa2b   :  { %v3290_v24 = vadd.f32 %v855_v21, %v847_v17 }
 0xa2c   :  { %2885 = vtanh.f32 %v3288_v23 }
 0xa2d   :  { %2887 = vtanh.f32 %v3290_v24 }
 0xa36   :  { %v2886_v26 = vpop.eup %2885 }
 0xa37   :  { %v2888_v27 = vpop.eup %2887  ;;  %787 = vrot.lane.b32.xlu0 %v2886_v26, %s2994_s30 }
 0xa38   :  { %860 = vrot.lane.b32.xlu1 %v2888_v27, %s2994_s30 }
 0xaa9   :  { %v788_v30 = vpop.permute.xlu0 %787 }
 0xaaa   :  { %v861_v25 = vpop.permute.xlu1 %860  ;;  %v3296_v31 = vmul.f32 %v2882_v11, %v788_v30 }
 0xaab   :  { %v863_v28 = vmul.f32 %v2884_v13, %v861_v25 }
 0xaac   :  { %v865_v33 = vpack.c.bf16 %v3296_v31, %v3296_v31 }
 0xaad   :  { %v864_v36 = vpack.c.bf16 %v863_v28, %v863_v28 }
 0xaae   :  { %867 = vrot.lane.b32.xlu0 %v865_v33, %s2995_s10 }
 0xaaf   :  { %913 = vrot.lane.b32.xlu1 %v864_v36, %s2995_s10 }
 0xb20   :  { %v868_v29 = vpop.permute.xlu0 %867 }
 0xb21   :  { %v914_v37 = vpop.permute.xlu1 %913  ;;  %2693 = vmatmul.mubr.msk.bf16.vlgmr.msra.gmra.mrb[24].mxu1 %vm197_vm2, %v868_v29 }
 0xb22   :  { %2701 = vmatmul.mubr.msk.bf16.vlgmr.msra.gmra.mrb[24].mxu0 %vm197_vm2, %v914_v37  ;;  %2705 = vmatpush3.bf16.msra.mxu1 %v3060_v3 }
 0xb23   :  { %2706 = vmatprep.subr.bf16.mxu1 %v2991_v2  ;;  %2708 = vmatprep.mubr.msk.bf16.mxu1 %vm2992_vm0, %v2991_v2 }
 0xb24   :  { %2713 = vmatpush3.bf16.msra.mxu0 %v3120_v35  ;;  %2716 = vmatprep.mubr.msk.bf16.mxu0 %vm2992_vm0, %v2991_v2 }
 0xb25   :  { %2714 = vmatprep.subr.bf16.mxu0 %v2991_v2 }
 0xb26   :  { %2707 = vmatpush3.bf16.msra.mxu1 %v3071_v5 }
 0xb27   :  { %2720 = vmatprep.subr.bf16.mxu1 %v2991_v2 }
 0xb28   :  { %2715 = vmatpush3.bf16.msra.mxu0 %v3138_v40 }
 0xb29   :  { %2709 = vmatmul.mubr.msk.bf16.vlgmr.msra.gmra.mrb[28].mxu1 %vm197_vm2, %v914_v37  ;;  %2728 = vmatprep.subr.bf16.mxu0 %v2991_v2 }
 0xb2a   :  { %2721 = vmatpush3.bf16.msra.mxu1 %v3147_v43  ;;  %2724 = vmatprep.mubr.msk.bf16.mxu1 %vm2992_vm0, %v2991_v2 }
 0xb2b   :  { %2722 = vmatprep.subr.bf16.mxu1 %v2991_v2 }
 0xb2e   :  { %2723 = vmatpush3.bf16.msra.mxu1 %v3157_v45 }
 0xb2f   :  { %2736 = vmatprep.subr.bf16.mxu1 %v2991_v2 }
 0xbf4   :  { %v906_v38 = vpop.f32.mrb[24].mxu1 }
 0xbf5   :  { %v952_v34 = vpop.f32.mrb[24].mxu0  ;;  %v2694_v39 = vpop.f32.mrb[25].mxu1 }
 0xbf6   :  { %v953_v42 = vadd.f32 %v952_v34, %v906_v38  ;;  %v2702_v44 = vpop.f32.mrb[25].mxu0  ;;  %v909_v46 = vpop.f32.mrb[26].mxu1 }
 0xbf7   :  { %v955_v47 = vpop.f32.mrb[26].mxu0  ;;  %v2695_v48 = vpop.f32.mrb[27].mxu1  ;;  %v165_v44 = vadd.f32 %v3103_v18, %v3171_v52 }
 0xbf8   :  { %v958_v53 = vadd.f32 %v3192_v59, %v953_v42  ;;  %v2703_v54 = vpop.f32.mrb[27].mxu0 }
 0xbfa   :  { %2889 = vtanh.f32 %v958_v53  ;;  %v2446_v0 = vmul.f32 -1.442695, %v958_v53 }
 0xbfc   :  { %v1025_v56 = vpop.f32.mrb[28].mxu1 }
 0xbfd   :  { %v1031_v57 = vadd.f32 %v1025_v56, %v162_v55  ;;  %v2710_v58 = vpop.f32.mrb[29].mxu1 }
 0xbfe   :  { %v1028_v60 = vpop.f32.mrb[30].mxu1 }
 0xbff   :  { %2891 = vtanh.f32 %v1031_v57  ;;  %v2711_v61 = vpop.f32.mrb[31].mxu1  ;;  %v2448_v1 = vmul.f32 -1.442695, %v1031_v57 }
 0xc00   :  { %2893 = vpow2.f32 %v2446_v0 }
 0xc01   :  { %2895 = vpow2.f32 %v2448_v1 }
 0xc04   :  { %v2890_v62 = vpop.eup %2889 }
 0xc05   :  { %968 = vrot.lane.b32.xlu0 %v2890_v62, %s2994_s30 }
 0xc09   :  { %v2892_v63 = vpop.eup %2891 }
 0xc0a   :  { %1041 = vrot.lane.b32.xlu1 %v2892_v63, %s2994_s30  ;;  %v2894_v4 = vpop.eup %2893 }
 0xc0b   :  { %v962_v22 = vadd.f32 1.0, %v2894_v4  ;;  %v2896_v6 = vpop.eup %2895 }
 0xc0c   :  { %v1035_v50 = vadd.f32 1.0, %v2896_v6 }
 0xc0d   :  { %2897 = vrcp.f32 %v962_v22 }
 0xc0e   :  { %2899 = vrcp.f32 %v1035_v50 }
 0xc17   :  { %v2898_v7 = vpop.eup %2897 }
 0xc18   :  { %v2900_v10 = vpop.eup %2899  ;;  %v966_v13 = vmul.f32 %v2898_v7, %v3288_v23 }
 0xc19   :  { %v1039_v15 = vmul.f32 %v2900_v10, %v3290_v24 }
 0xc77   :  { %v969_v8 = vpop.permute.xlu0 %968 }
 0xc78   :  { %v971_v9 = vmul.f32 %v2898_v7, %v969_v8 }
 0xc7a   :  { %973 = vrot.lane.b32.xlu0 %v971_v9, %s2995_s10 }
 0xc7c   :  { %v1042_v11 = vpop.permute.xlu1 %1041 }
 0xc7d   :  { %v1044_v12 = vmul.f32 %v2900_v10, %v1042_v11 }
 0xc7f   :  { %1046 = vrot.lane.b32.xlu1 %v1044_v12, %s2995_s10 }
 0xcec   :  { %v974_v19 = vpop.permute.xlu0 %973 }
 0xced   :  { %v3331_v14 = vadd.f32 %v974_v19, %v966_v13 }
 0xcef   :  { %2901 = vtanh.f32 %v3331_v14 }
 0xcf1   :  { %v1047_v16 = vpop.permute.xlu1 %1046 }
 0xcf2   :  { %v3335_v17 = vadd.f32 %v1047_v16, %v1039_v15 }
 0xcf4   :  { %2903 = vtanh.f32 %v3335_v17 }
 0xcf9   :  { %v2902_v20 = vpop.eup %2901 }
 0xcfa   :  { %979 = vrot.lane.b32.xlu0 %v2902_v20, %s2994_s30 }
 0xcfe   :  { %v2904_v21 = vpop.eup %2903 }
 0xcff   :  { %1052 = vrot.lane.b32.xlu1 %v2904_v21, %s2994_s30 }
 0xd6c   :  { %v980_v26 = vpop.permute.xlu0 %979 }
 0xd6d   :  { %v3340_v23 = vmul.f32 %v2898_v7, %v980_v26 }
 0xd6f   :  { %v1057_v27 = vpack.c.bf16 %v3340_v23, %v3340_v23 }
 0xd71   :  { %1059 = vrot.lane.b32.xlu0 %v1057_v27, %s2995_s10  ;;  %v1053_v24 = vpop.permute.xlu1 %1052 }
 0xd72   :  { %v1055_v30 = vmul.f32 %v2900_v10, %v1053_v24 }
 0xd74   :  { %v1056_v25 = vpack.c.bf16 %v1055_v30, %v1055_v30 }
 0xd76   :  { %1105 = vrot.lane.b32.xlu1 %v1056_v25, %s2995_s10 }
 0xde3   :  { %v1060_v28 = vpop.permute.xlu0 %1059 }
 0xde4   :  { %2717 = vmatmul.mubr.msk.bf16.vlgmr.msra.gmra.mrb[28].mxu0 %vm197_vm2, %v1060_v28 }
 0xde5   :  { %2729 = vmatpush3.bf16.msra.mxu0 %v3060_v3  ;;  %2732 = vmatprep.mubr.msk.bf16.mxu0 %vm2992_vm0, %v2991_v2 }
 0xde6   :  { %2730 = vmatprep.subr.bf16.mxu0 %v2991_v2 }
 0xde8   :  { %v1106_v33 = vpop.permute.xlu1 %1105 }
 0xde9   :  { %2731 = vmatpush3.bf16.msra.mxu0 %v3071_v5  ;;  %2725 = vmatmul.mubr.msk.bf16.vlgmr.msra.gmra.mrb[32].mxu1 %vm197_vm2, %v1106_v33 }
 0xdea   :  { %2744 = vmatprep.subr.bf16.mxu0 %v2991_v2  ;;  %2737 = vmatpush3.bf16.msra.mxu1 %v3120_v35 }
 0xdeb   :  { %2738 = vmatprep.subr.bf16.mxu1 %v2991_v2  ;;  %2740 = vmatprep.mubr.msk.bf16.mxu1 %vm2992_vm0, %v2991_v2 }
 0xdec   :  { %2733 = vmatmul.mubr.msk.bf16.vlgmr.msra.gmra.mrb[32].mxu0 %vm197_vm2, %v1106_v33 }
 0xded   :  { %2745 = vmatpush3.bf16.msra.mxu0 %v3147_v43  ;;  %2748 = vmatprep.mubr.msk.bf16.mxu0 %vm2992_vm0, %v2991_v2 }
 0xdee   :  { %2746 = vmatprep.subr.bf16.mxu0 %v2991_v2  ;;  %2739 = vmatpush3.bf16.msra.mxu1 %v3138_v40 }
 0xdef   :  { %2752 = vmatprep.subr.bf16.mxu1 %v2991_v2 }
 0xdf1   :  { %2747 = vmatpush3.bf16.msra.mxu0 %v3157_v45 }
 0xdf2   :  { %2760 = vmatprep.subr.bf16.mxu0 %v2991_v2 }
 0xeb7   :  { %v1098_v36 = vpop.f32.mrb[28].mxu0 }
 0xeb8   :  { %v2718_v29 = vpop.f32.mrb[29].mxu0 }
 0xeb9   :  { %v1101_v37 = vpop.f32.mrb[30].mxu0 }
 0xeba   :  { %v2719_v38 = vpop.f32.mrb[31].mxu0 }
 0xebb   :  { %v170_v38 = vadd.f32 %v3165_v49, %v3103_v18 }
 0xebc   :  { %v1144_v34 = vpop.f32.mrb[32].mxu1 }
 0xebd   :  { %v1145_v39 = vadd.f32 %v1144_v34, %v1098_v36  ;;  %v2726_v42 = vpop.f32.mrb[33].mxu1 }
 0xebe   :  { %v1147_v46 = vpop.f32.mrb[34].mxu1 }
 0xebf   :  { %v1150_v47 = vadd.f32 %v3192_v59, %v1145_v39  ;;  %v1217_v48 = vpop.f32.mrb[32].mxu0  ;;  %v2727_v53 = vpop.f32.mrb[35].mxu1 }
 0xec0   :  { %v1223_v54 = vadd.f32 %v1217_v48, %v165_v44  ;;  %v2734_v55 = vpop.f32.mrb[33].mxu0 }
 0xec1   :  { %2905 = vtanh.f32 %v1150_v47  ;;  %v1220_v56 = vpop.f32.mrb[34].mxu0  ;;  %v2451_v61 = vmul.f32 -1.442695, %v1150_v47 }
 0xec2   :  { %2907 = vtanh.f32 %v1223_v54  ;;  %v2735_v57 = vpop.f32.mrb[35].mxu0  ;;  %v2453_v62 = vmul.f32 -1.442695, %v1223_v54 }
 0xec3   :  { %2909 = vpow2.f32 %v2451_v61 }
 0xec4   :  { %2911 = vpow2.f32 %v2453_v62 }
 0xecb   :  { %v2906_v58 = vpop.eup %2905 }
 0xecc   :  { %v2908_v60 = vpop.eup %2907  ;;  %1160 = vrot.lane.b32.xlu0 %v2906_v58, %s2994_s30 }
 0xecd   :  { %1233 = vrot.lane.b32.xlu1 %v2908_v60, %s2994_s30  ;;  %v2910_v52 = vpop.eup %2909 }
 0xece   :  { %v2912_v63 = vpop.eup %2911  ;;  %v1154_v0 = vadd.f32 1.0, %v2910_v52 }
 0xecf   :  { %v1227_v1 = vadd.f32 1.0, %v2912_v63 }
 0xed0   :  { %2913 = vrcp.f32 %v1154_v0 }
 0xed1   :  { %2915 = vrcp.f32 %v1227_v1 }
 0xeda   :  { %v2914_v4 = vpop.eup %2913 }
 0xedb   :  { %v2916_v6 = vpop.eup %2915  ;;  %v1158_v9 = vmul.f32 %v2914_v4, %v3331_v14 }
 0xedc   :  { %v1231_v10 = vmul.f32 %v2916_v6, %v3335_v17 }
 0xf3e   :  { %v1161_v22 = vpop.permute.xlu0 %1160 }
 0xf3f   :  { %v1234_v50 = vpop.permute.xlu1 %1233  ;;  %v1163_v7 = vmul.f32 %v2914_v4, %v1161_v22 }
 0xf40   :  { %v1236_v8 = vmul.f32 %v2916_v6, %v1234_v50 }
 0xf41   :  { %1165 = vrot.lane.b32.xlu0 %v1163_v7, %s2995_s10 }
 0xf42   :  { %1238 = vrot.lane.b32.xlu1 %v1236_v8, %s2995_s10 }
 0xfb3   :  { %v1166_v11 = vpop.permute.xlu0 %1165 }
 0xfb4   :  { %v1239_v12 = vpop.permute.xlu1 %1238  ;;  %v3376_v13 = vadd.f32 %v1166_v11, %v1158_v9 }
 0xfb5   :  { %v3378_v19 = vadd.f32 %v1239_v12, %v1231_v10 }
 0xfb6   :  { %2917 = vtanh.f32 %v3376_v13 }
 0xfb7   :  { %2919 = vtanh.f32 %v3378_v19 }
 0xfc0   :  { %v2918_v15 = vpop.eup %2917 }
 0xfc1   :  { %v2920_v16 = vpop.eup %2919  ;;  %1171 = vrot.lane.b32.xlu0 %v2918_v15, %s2994_s30  ;;  %v2961_v15 = vld [vmem:[%s3593_s2] sm:$0xff]  }
 0xfc2   :  { %1244 = vrot.lane.b32.xlu1 %v2920_v16, %s2994_s30 }
0x1033   :  { %v1172_v20 = vpop.permute.xlu0 %1171 }
0x1034   :  { %v1245_v14 = vpop.permute.xlu1 %1244  ;;  %v3384_v21 = vmul.f32 %v2914_v4, %v1172_v20  ;;  %v2962_v20 = vld [vmem:[%s3593_s2 + $0x8] sm:$0xff]  }
0x1035   :  { %v1247_v17 = vmul.f32 %v2916_v6, %v1245_v14  ;;  %v2963_v14 = vld [vmem:[%s3595_s4] sm:$0xff]  }
0x1036   :  { %v1249_v26 = vpack.c.bf16 %v3384_v21, %v3384_v21 }
0x1037   :  { %v1248_v27 = vpack.c.bf16 %v1247_v17, %v1247_v17  ;;  %v2964_v17 = vld [vmem:[%s3595_s4 + $0x8] sm:$0xff]  }
0x1038   :  { %1251 = vrot.lane.b32.xlu0 %v1249_v26, %s2995_s10 }
0x1039   :  { %1297 = vrot.lane.b32.xlu1 %v1248_v27, %s2995_s10 }
0x10aa   :  { %v1252_v24 = vpop.permute.xlu0 %1251 }
0x10ab   :  { %v1298_v30 = vpop.permute.xlu1 %1297  ;;  %2741 = vmatmul.mubr.msk.bf16.vlgmr.msra.gmra.mrb[36].mxu1 %vm197_vm2, %v1252_v24 }
0x10ac   :  { %2749 = vmatmul.mubr.msk.bf16.vlgmr.msra.gmra.mrb[36].mxu0 %vm197_vm2, %v1298_v30  ;;  %2753 = vmatpush3.bf16.msra.mxu1 %v3060_v3 }
0x10ad   :  { %2754 = vmatprep.subr.bf16.mxu1 %v2991_v2  ;;  %2756 = vmatprep.mubr.msk.bf16.mxu1 %vm2992_vm0, %v2991_v2 }
0x10ae   :  { %2761 = vmatpush3.bf16.msra.mxu0 %v3120_v35  ;;  %2764 = vmatprep.mubr.msk.bf16.mxu0 %vm2992_vm0, %v2991_v2 }
0x10af   :  { %2762 = vmatprep.subr.bf16.mxu0 %v2991_v2 }
0x10b0   :  { %2755 = vmatpush3.bf16.msra.mxu1 %v3071_v5 }
0x10b1   :  { %2768 = vmatprep.subr.bf16.mxu1 %v2991_v2 }
0x10b2   :  { %2763 = vmatpush3.bf16.msra.mxu0 %v3138_v40 }
0x10b3   :  { %2757 = vmatmul.mubr.msk.bf16.vlgmr.msra.gmra.mrb[40].mxu1 %vm197_vm2, %v1298_v30  ;;  %2776 = vmatprep.subr.bf16.mxu0 %v2991_v2 }
0x10b4   :  { %2769 = vmatpush3.bf16.msra.mxu1 %v3147_v43  ;;  %2772 = vmatprep.mubr.msk.bf16.mxu1 %vm2992_vm0, %v2991_v2 }
0x10b5   :  { %2770 = vmatprep.subr.bf16.mxu1 %v2991_v2 }
0x10b8   :  { %2771 = vmatpush3.bf16.msra.mxu1 %v3157_v45 }
0x10b9   :  { %2784 = vmatprep.subr.bf16.mxu1 %v2991_v2 }
0x117e   :  { %v1290_v3 = vpop.f32.mrb[36].mxu1 }
0x117f   :  { %v1336_v5 = vpop.f32.mrb[36].mxu0  ;;  %v2742_v35 = vpop.f32.mrb[37].mxu1 }
0x1180   :  { %v1337_v25 = vadd.f32 %v1336_v5, %v1290_v3  ;;  %v2750_v40 = vpop.f32.mrb[37].mxu0  ;;  %v1293_v28 = vpop.f32.mrb[38].mxu1 }
0x1181   :  { %v1339_v33 = vpop.f32.mrb[38].mxu0  ;;  %v2743_v36 = vpop.f32.mrb[39].mxu1 }
0x1182   :  { %v1342_v29 = vadd.f32 %v3192_v59, %v1337_v25  ;;  %v2751_v37 = vpop.f32.mrb[39].mxu0 }
0x1184   :  { %2921 = vtanh.f32 %v1342_v29  ;;  %v2456_v53 = vmul.f32 -1.442695, %v1342_v29 }
0x1186   :  { %v1409_v34 = vpop.f32.mrb[40].mxu1 }
0x1187   :  { %v1415_v39 = vadd.f32 %v1409_v34, %v170_v38  ;;  %v2758_v42 = vpop.f32.mrb[41].mxu1 }
0x1188   :  { %v1412_v44 = vpop.f32.mrb[42].mxu1 }
0x1189   :  { %2923 = vtanh.f32 %v1415_v39  ;;  %v2759_v46 = vpop.f32.mrb[43].mxu1  ;;  %v2458_v54 = vmul.f32 -1.442695, %v1415_v39 }
0x118a   :  { %2925 = vpow2.f32 %v2456_v53 }
0x118b   :  { %2927 = vpow2.f32 %v2458_v54 }
0x118e   :  { %v2922_v47 = vpop.eup %2921 }
0x118f   :  { %1352 = vrot.lane.b32.xlu0 %v2922_v47, %s2994_s30 }
0x1193   :  { %v2924_v48 = vpop.eup %2923 }
0x1194   :  { %1425 = vrot.lane.b32.xlu1 %v2924_v48, %s2994_s30  ;;  %v2926_v55 = vpop.eup %2925 }
0x1195   :  { %v1346_v56 = vadd.f32 1.0, %v2926_v55  ;;  %v2928_v57 = vpop.eup %2927 }
0x1196   :  { %v1419_v18 = vadd.f32 1.0, %v2928_v57 }
0x1197   :  { %2929 = vrcp.f32 %v1346_v56 }
0x1198   :  { %2931 = vrcp.f32 %v1419_v18 }
0x11a1   :  { %v2930_v49 = vpop.eup %2929 }
0x11a2   :  { %v2932_v61 = vpop.eup %2931  ;;  %v1350_v63 = vmul.f32 %v2930_v49, %v3376_v13 }
0x11a3   :  { %v1423_v4 = vmul.f32 %v2932_v61, %v3378_v19 }
0x1201   :  { %v1353_v58 = vpop.permute.xlu0 %1352 }
0x1202   :  { %v1355_v60 = vmul.f32 %v2930_v49, %v1353_v58 }
0x1204   :  { %1357 = vrot.lane.b32.xlu0 %v1355_v60, %s2995_s10 }
0x1206   :  { %v1426_v62 = vpop.permute.xlu1 %1425 }
0x1207   :  { %v1428_v52 = vmul.f32 %v2932_v61, %v1426_v62 }
0x1209   :  { %1430 = vrot.lane.b32.xlu1 %v1428_v52, %s2995_s10 }
0x1276   :  { %v1358_v0 = vpop.permute.xlu0 %1357 }
0x1277   :  { %v3419_v1 = vadd.f32 %v1358_v0, %v1350_v63 }
0x1279   :  { %2933 = vtanh.f32 %v3419_v1 }
0x127b   :  { %v1431_v22 = vpop.permute.xlu1 %1430 }
0x127c   :  { %v3423_v6 = vadd.f32 %v1431_v22, %v1423_v4 }
0x127e   :  { %2935 = vtanh.f32 %v3423_v6 }
0x1283   :  { %v2934_v50 = vpop.eup %2933 }
0x1284   :  { %1363 = vrot.lane.b32.xlu0 %v2934_v50, %s2994_s30 }
0x1288   :  { %v2936_v7 = vpop.eup %2935 }
0x1289   :  { %1436 = vrot.lane.b32.xlu1 %v2936_v7, %s2994_s30 }
0x12f6   :  { %v1364_v8 = vpop.permute.xlu0 %1363 }
0x12f7   :  { %v3428_v9 = vmul.f32 %v2930_v49, %v1364_v8 }
0x12f9   :  { %v1441_v10 = vpack.c.bf16 %v3428_v9, %v3428_v9 }
0x12fb   :  { %1443 = vrot.lane.b32.xlu0 %v1441_v10, %s2995_s10  ;;  %v1437_v11 = vpop.permute.xlu1 %1436 }
0x12fc   :  { %v1439_v12 = vmul.f32 %v2932_v61, %v1437_v11 }
0x12fe   :  { %v1440_v13 = vpack.c.bf16 %v1439_v12, %v1439_v12 }
0x1300   :  { %1489 = vrot.lane.b32.xlu1 %v1440_v13, %s2995_s10 }
0x136d   :  { %v1444_v19 = vpop.permute.xlu0 %1443 }
0x136e   :  { %2765 = vmatmul.mubr.msk.bf16.vlgmr.msra.gmra.mrb[40].mxu0 %vm197_vm2, %v1444_v19 }
0x136f   :  { %2777 = vmatpush3.bf16.msra.mxu0 %v2961_v15  ;;  %2780 = vmatprep.mubr.msk.bf16.mxu0 %vm2992_vm0, %v2991_v2 }
0x1370   :  { %2778 = vmatprep.subr.bf16.mxu0 %v2991_v2 }
0x1372   :  { %v1490_v16 = vpop.permute.xlu1 %1489 }
0x1373   :  { %2779 = vmatpush3.bf16.msra.mxu0 %v2962_v20  ;;  %2773 = vmatmul.mubr.msk.bf16.vlgmr.msra.gmra.mrb[44].mxu1 %vm197_vm2, %v1490_v16  ;;  %v2966_v20 = vld [vmem:[%s3598_s7] ss:$0 sm:$0xff] }
0x1374   :  { %2792 = vmatprep.subr.bf16.mxu0 %v2991_v2  ;;  %2785 = vmatpush3.bf16.msra.mxu1 %v2963_v14 }
0x1375   :  { %2786 = vmatprep.subr.bf16.mxu1 %v2991_v2  ;;  %2788 = vmatprep.mubr.msk.bf16.mxu1 %vm2992_vm0, %v2991_v2 }
0x1376   :  { %2781 = vmatmul.mubr.msk.bf16.vlgmr.msra.gmra.mrb[44].mxu0 %vm197_vm2, %v1490_v16 }
0x1377   :  { %2793 = vmatpush3.bf16.msra.mxu0 %v3147_v43  ;;  %2796 = vmatprep.mubr.msk.bf16.mxu0 %vm2992_vm0, %v2991_v2  ;;  %v2965_v43 = vld [vmem:[%s3597_s6] ss:$0 sm:$0xff] }
0x1378   :  { %2794 = vmatprep.subr.bf16.mxu0 %v2991_v2  ;;  %2787 = vmatpush3.bf16.msra.mxu1 %v2964_v17  ;;  %v173_v2 = vadd.f32 %v2965_v43, %v3169_v51 }
0x137b   :  { %2795 = vmatpush3.bf16.msra.mxu0 %v3157_v45 }
0x1441   :  { %v1482_v26 = vpop.f32.mrb[40].mxu0 }
0x1442   :  { %v2766_v27 = vpop.f32.mrb[41].mxu0 }
0x1443   :  { %v1485_v24 = vpop.f32.mrb[42].mxu0 }
0x1444   :  { %v2767_v30 = vpop.f32.mrb[43].mxu0 }
0x1446   :  { %v1528_v3 = vpop.f32.mrb[44].mxu1 }
0x1447   :  { %v1529_v5 = vadd.f32 %v1528_v3, %v1482_v26  ;;  %v2774_v35 = vpop.f32.mrb[45].mxu1 }
0x1448   :  { %v1531_v25 = vpop.f32.mrb[46].mxu1 }
0x1449   :  { %v1534_v40 = vadd.f32 %v3192_v59, %v1529_v5  ;;  %v1601_v28 = vpop.f32.mrb[44].mxu0  ;;  %v2775_v33 = vpop.f32.mrb[47].mxu1 }
0x144a   :  { %v1607_v36 = vadd.f32 %v1601_v28, %v173_v2  ;;  %v2782_v45 = vpop.f32.mrb[45].mxu0  ;;  %v2832_v33 = vld [vmem:[%s3596_s5 + $0x8] sm:$0xff]  }
0x144b   :  { %2937 = vtanh.f32 %v1534_v40  ;;  %v1604_v29 = vpop.f32.mrb[46].mxu0  ;;  %v2461_v39 = vmul.f32 -1.442695, %v1534_v40 }
0x144c   :  { %2939 = vtanh.f32 %v1607_v36  ;;  %v2783_v37 = vpop.f32.mrb[47].mxu0  ;;  %v2463_v42 = vmul.f32 -1.442695, %v1607_v36 }
0x144d   :  { %2941 = vpow2.f32 %v2461_v39 }
0x144e   :  { %2943 = vpow2.f32 %v2463_v42 }
0x1455   :  { %v2938_v38 = vpop.eup %2937 }
0x1456   :  { %v2940_v34 = vpop.eup %2939  ;;  %1544 = vrot.lane.b32.xlu0 %v2938_v38, %s2994_s30 }
0x1457   :  { %1617 = vrot.lane.b32.xlu1 %v2940_v34, %s2994_s30  ;;  %v2942_v51 = vpop.eup %2941 }
0x1458   :  { %v2944_v59 = vpop.eup %2943  ;;  %v1538_v44 = vadd.f32 1.0, %v2942_v51 }
0x1459   :  { %v1611_v46 = vadd.f32 1.0, %v2944_v59 }
0x145a   :  { %2945 = vrcp.f32 %v1538_v44 }
0x145b   :  { %2947 = vrcp.f32 %v1611_v46 }
0x1464   :  { %v2946_v47 = vpop.eup %2945 }
0x1465   :  { %v2948_v53 = vpop.eup %2947  ;;  %v1542_v57 = vmul.f32 %v2946_v47, %v3419_v1 }
0x1466   :  { %v1615_v18 = vmul.f32 %v2948_v53, %v3423_v6 }
0x14c8   :  { %v1545_v48 = vpop.permute.xlu0 %1544 }
0x14c9   :  { %v1618_v54 = vpop.permute.xlu1 %1617  ;;  %v1547_v55 = vmul.f32 %v2946_v47, %v1545_v48 }
0x14ca   :  { %v1620_v56 = vmul.f32 %v2948_v53, %v1618_v54 }
0x14cb   :  { %1549 = vrot.lane.b32.xlu0 %v1547_v55, %s2995_s10  ;;  %v2996_v55 = vmov 1966171168  }
0x14cc   :  { %1622 = vrot.lane.b32.xlu1 %v1620_v56, %s2995_s10  ;;  %v1872_v56 = vunpack.c.l.s4 %v2996_v55 }
0x153d   :  { %v1550_v49 = vpop.permute.xlu0 %1549 }
0x153e   :  { %v1623_v58 = vpop.permute.xlu1 %1622  ;;  %v1552_v60 = vadd.f32 %v1550_v49, %v1542_v57  ;;  %v1874_v57 = vlaneseq }
0x153f   :  { %v1625_v61 = vadd.f32 %v1623_v58, %v1615_v18  ;;  %v1873_v18 = vunpack.c.0.s8 %v1872_v56  ;;  %v3519_v58 = vld [vmem:[%s3599_s8] ss:$0 sm:$0xff]  ;;  %s2997_s8 = smov [#allocation4]  }
0x1540   :  { %2949 = vtanh.f32 %v1552_v60  ;;  %v1875_v49 = vshrl.u32 %v1874_v57, 7 }
0x1541   :  { %2951 = vtanh.f32 %v1625_v61 }
0x154a   :  { %v2950_v62 = vpop.eup %2949 }
0x154b   :  { %v2952_v52 = vpop.eup %2951  ;;  %1555 = vrot.lane.b32.xlu0 %v2950_v62, %s2994_s30 }
0x154c   :  { %1628 = vrot.lane.b32.xlu1 %v2952_v52, %s2994_s30 }
0x15bd   :  { %v1556_v63 = vpop.permute.xlu0 %1555 }
0x15be   :  { %v1629_v0 = vpop.permute.xlu1 %1628  ;;  %v1558_v4 = vmul.f32 %v2946_v47, %v1556_v63 }
0x15bf   :  { %v1631_v22 = vmul.f32 %v2948_v53, %v1629_v0 }
0x15c0   :  { %v1633_v50 = vpack.c.bf16 %v1558_v4, %v1558_v4 }
0x15c1   :  { %v1632_v1 = vpack.c.bf16 %v1631_v22, %v1631_v22 }
0x15c2   :  { %1635 = vrot.lane.b32.xlu0 %v1633_v50, %s2995_s10 }
0x15c3   :  { %1681 = vrot.lane.b32.xlu1 %v1632_v1, %s2995_s10 }
0x1634   :  { %v1636_v6 = vpop.permute.xlu0 %1635 }
0x1635   :  { %v1682_v7 = vpop.permute.xlu1 %1681  ;;  %2789 = vmatmul.mubr.msk.bf16.vlgmr.msra.gmra.mrb[48].mxu1 %vm197_vm2, %v1636_v6 }
0x1636   :  { %2797 = vmatmul.mubr.msk.bf16.vlgmr.msra.gmra.mrb[48].mxu0 %vm197_vm2, %v1682_v7 }
0x1708   :  { %v1674_v8 = vpop.f32.mrb[48].mxu1 }
0x1709   :  { %v1720_v10 = vpop.f32.mrb[48].mxu0  ;;  %v2790_v11 = vpop.f32.mrb[49].mxu1 }
0x170a   :  { %v1721_v12 = vadd.f32 %v1720_v10, %v1674_v8  ;;  %v2798_v13 = vpop.f32.mrb[49].mxu0  ;;  %v1677_v19 = vpop.f32.mrb[50].mxu1 }
0x170b   :  { %v1723_v15 = vpop.f32.mrb[50].mxu0  ;;  %v2791_v16 = vpop.f32.mrb[51].mxu1 }
0x170c   :  { %v1726_v14 = vadd.f32 %v2966_v20, %v1721_v12  ;;  %v2799_v17 = vpop.f32.mrb[51].mxu0 }
0x170e   :  { %2953 = vtanh.f32 %v1726_v14  ;;  %v2466_v27 = vmul.f32 -1.442695, %v1726_v14 }
0x1710   :  { %2955 = vpow2.f32 %v2466_v27 }
0x1718   :  { %v2954_v26 = vpop.eup %2953 }
0x1719   :  { %1736 = vrot.lane.b32.xlu0 %v2954_v26, %s2994_s30 }
0x171a   :  { %v2956_v24 = vpop.eup %2955 }
0x171b   :  { %v1730_v30 = vadd.f32 1.0, %v2956_v24 }
0x171d   :  { %2957 = vrcp.f32 %v1730_v30 }
0x1727   :  { %v2958_v3 = vpop.eup %2957 }
0x1728   :  { %v1734_v43 = vmul.f32 %v2958_v3, %v1552_v60  ;;  %v3521_v60 = vsub.s32 %v1873_v18, %v1875_v49 }
0x178b   :  { %v1737_v5 = vpop.permute.xlu0 %1736 }
0x178c   :  { %v1739_v35 = vmul.f32 %v2958_v3, %v1737_v5 }
0x178e   :  { %1741 = vrot.lane.b32.xlu1 %v1739_v35, %s2995_s10 }
0x1792   :  { %409 = vrot.lane.b32.xlu1 %v3208_v41, %s2995_s10  ;;  %v2831_v41 = vld [vmem:[%s3596_s5] sm:$0xff]  }
0x1793   :  { %2800 = vmatprep.subr.bf16.mxu1 %v2831_v41 }
0x1794   :  { %2801 = vmatpush3.bf16.msra.mxu1 %v2831_v41 }
0x1795   :  { %2802 = vmatprep.subr.bf16.mxu1 %v2832_v33 }
0x1796   :  { %792 = vrot.lane.b32.xlu1 %v3296_v31, %s2995_s10 }
0x1798   :  { %2803 = vmatpush3.bf16.msra.mxu1 %v2832_v33 }
0x179a   :  { %1176 = vrot.lane.b32.xlu1 %v3384_v21, %s2995_s10 }
0x179e   :  { %1560 = vrot.lane.b32.xlu1 %v1558_v4, %s2995_s10 }
0x1800   :  { %v1742_v2 = vpop.permute.xlu1 %1741 }
0x1801   :  { %v1744_v25 = vadd.f32 %v1742_v2, %v1734_v43 }
0x1803   :  { %2959 = vtanh.f32 %v1744_v25 }
0x1804   :  { %v410_v40 = vpop.permute.xlu1 %409 }
0x1805   :  { %412 = vst.msk [vmem:[#allocation3] sm:$0xff] %vm197_vm2, %v410_v40 }
0x1808   :  { %v793_v28 = vpop.permute.xlu1 %792 }
0x1809   :  { %796 = vst.msk [vmem:[#allocation3 + $0x10] sm:$0xff] %vm197_vm2, %v793_v28 }
0x180c   :  { %v1177_v31 = vpop.permute.xlu1 %1176  ;;  %v1757_v39 = vld [vmem:[#allocation3] sm:$0xff] }
0x180d   :  { %v2960_v21 = vpop.eup %2959  ;;  %1180 = vst.msk [vmem:[#allocation3 + $0x20] sm:$0xff] %vm197_vm2, %v1177_v31 }
0x180e   :  { %1747 = vrot.lane.b32.xlu0 %v2960_v21, %s2994_s30 }
0x1810   :  { %v1561_v36 = vpop.permute.xlu1 %1560 }
0x1811   :  { %1564 = vst.msk [vmem:[#allocation3 + $0x30] sm:$0xff] %vm197_vm2, %v1561_v36 }
0x1812   :  { %600 = vrot.lane.b32.xlu0 %v3252_v32, %s2995_s10 }
0x1814   :  { %v1761_v59 = vld [vmem:[#allocation3 + $0x20] sm:$0xff] }
0x1816   :  { %984 = vrot.lane.b32.xlu0 %v3340_v23, %s2995_s10  ;;  %v1759_v23 = vld [vmem:[#allocation3 + $0x10] sm:$0xff] }
0x1818   :  { %v1763_v48 = vld [vmem:[#allocation3 + $0x30] sm:$0xff] }
0x181a   :  { %1368 = vrot.lane.b32.xlu0 %v3428_v9, %s2995_s10 }
0x1880   :  { %v1748_v45 = vpop.permute.xlu0 %1747 }
0x1881   :  { %v1750_v29 = vmul.f32 %v2958_v3, %v1748_v45 }
0x1883   :  { %1752 = vrot.lane.b32.xlu0 %v1750_v29, %s2995_s10  ;;  %s2402_s10 = sshll.u32 %s2997_s8, 4  ;;  %s2403_s10 = int_to_ptr.vmem [resolvable:$true] %s2402_s10 }
0x1884   :  { %v601_v37 = vpop.permute.xlu0 %600  ;;  %s2967_s19 = scalar_lea.vmem %s2403_s10, 1024  ;;  %p2972_p1 = scmp.lt.s32.totalorder %s2403_s10, %s2403_s10 }
0x1885   :  { %604 = vst.msk [vmem:[#allocation3 + $0x8] sm:$0xff] %vm197_vm2, %v601_v37  ;;  %p2968_p0 = scmp.ne.s32.totalorder %s2403_s10, %s2967_s19  ;;  %p2973_p2 = scmp.lt.s32.totalorder %s2967_s19, %s2967_s19 }
0x1887   :  { %p2974_p3 = por %p2973_p2, %p2972_p1 }
0x1888   :  { %v985_v38 = vpop.permute.xlu0 %984 }
0x1889   :  { %988 = vst.msk [vmem:[#allocation3 + $0x18] sm:$0xff] %vm197_vm2, %v985_v38  ;;  %p2975_p4 = pnand %p2974_p3, %p2968_p0 }
0x188c   :  { %v1369_v34 = vpop.permute.xlu0 %1368  ;;  %v1758_v42 = vld [vmem:[#allocation3 + $0x8] sm:$0xff] }
0x188d   :  { %1372 = vst.msk [vmem:[#allocation3 + $0x28] sm:$0xff] %vm197_vm2, %v1369_v34  ;;  %v1765_v32 = vpack.c.bf16 %v1758_v42, %v1757_v39 }
0x188f   :  { %2804 = vmatprep.mubr.msk.bf16.mxu1 %vm197_vm2, %v1765_v32 }
0x1890   :  { %v1760_v9 = vld [vmem:[#allocation3 + $0x18] sm:$0xff] }
0x1891   :  { %v1766_v51 = vpack.c.bf16 %v1760_v9, %v1759_v23 }
0x1893   :  { %2805 = vmatmul.mubr.msk.bf16.vlgmr.msra.gmra.mrb[52].mxu1 %vm197_vm2, %v1766_v51 }
0x1894   :  { %v1762_v44 = vld [vmem:[#allocation3 + $0x28] sm:$0xff] }
0x1895   :  { %v1767_v46 = vpack.c.bf16 %v1762_v44, %v1761_v59 }
0x1897   :  { %2808 = vmatprep.mubr.msk.bf16.mxu1 %vm197_vm2, %v1767_v46 }
0x18f5   :  { %v1753_v47 = vpop.permute.xlu0 %1752 }
0x18f6   :  { %1756 = vst.msk [vmem:[#allocation3 + $0x38] sm:$0xff] %vm197_vm2, %v1753_v47 }
0x18fd   :  { %v1764_v53 = vld [vmem:[#allocation3 + $0x38] sm:$0xff] }
0x18fe   :  { %v1768_v54 = vpack.c.bf16 %v1764_v53, %v1763_v48 }
0x1900   :  { %2809 = vmatmul.mubr.msk.bf16.gmra.mrb[56].mxu1 %vm197_vm2, %v1768_v54 }
0x1966   :  { %v2806_v61 = vpop.f32.mrb[52].mxu1 }
0x1967   :  { %v1847_v62 = vadd.f32 %v2806_v61, %v3519_v58  ;;  %v1838_v52 = vpop.f32.mrb[53].mxu1 }
0x1968   :  { %v1839_v63 = vadd.f32 %v3519_v58, %v1838_v52  ;;  %v2807_v0 = vpop.f32.mrb[54].mxu1 }
0x1969   :  { %v2002_v4 = vcombine.high %v1847_v62, %v1847_v62  ;;  %v2009_v22 = vrot.slane %v1847_v62, %v3521_v60  ;;  %v1850_v50 = vadd.f32 %v2807_v0, %v3519_v58  ;;  %v1841_v1 = vpop.f32.mrb[55].mxu1 }
0x196a   :  { %v1870_v6 = vcombine.high %v1839_v63, %v1839_v63  ;;  %v1877_v7 = vrot.slane %v1839_v63, %v3521_v60  ;;  %v1842_v8 = vadd.f32 %v3519_v58, %v1841_v1 }
0x196b   :  { %v2016_v10 = vrot.slane %v2002_v4, %v3521_v60  ;;  %v2017_v11 = vcombine.high %v2009_v22, %v2009_v22  ;;  %v2025_v12 = vrot.slane %v2009_v22, %v3521_v60  ;;  %2482 = vst.sshfl [vmem:[#allocation4 + $0x2] sm:$0x1 pattern:$0x73625140] %v2009_v22  ;;  %v2068_v13 = vcombine.high %v1850_v50, %v1850_v50 }
0x196c   :  { %v1884_v19 = vrot.slane %v1870_v6, %v3521_v60  ;;  %v1885_v15 = vcombine.high %v1877_v7, %v1877_v7  ;;  %v1893_v16 = vrot.slane %v1877_v7, %v3521_v60  ;;  %2474 = vst.sshfl [vmem:[#allocation4] sm:$0x1 pattern:$0x73625140] %v1877_v7  ;;  %v2075_v20 = vrot.slane %v1850_v50, %v3521_v60 }
0x196d   :  { %v2018_v14 = vcombine.high %v2016_v10, %v2016_v10  ;;  %v2032_v17 = vrot.slane %v2016_v10, %v3521_v60  ;;  %v2039_v26 = vrot.slane %v2017_v11, %v3521_v60  ;;  %v2047_v27 = vcombine.high %v2025_v12, %v2025_v12  ;;  %2483 = vst.sshfl [vmem:[#allocation4 + $0xa] sm:$0x1 pattern:$0x73625140] %v2017_v11 }
0x196e   :  { %2484 = vst.sshfl [vmem:[#allocation4 + $0x22] sm:$0x1 pattern:$0x73625140] %v2016_v10  ;;  %v1886_v24 = vcombine.high %v1884_v19, %v1884_v19  ;;  %v1900_v30 = vrot.slane %v1884_v19, %v3521_v60  ;;  %v1907_v3 = vrot.slane %v1885_v15, %v3521_v60  ;;  %v1915_v5 = vcombine.high %v1893_v16, %v1893_v16 }
0x196f   :  { %2475 = vst.sshfl [vmem:[#allocation4 + $0x8] sm:$0x1 pattern:$0x73625140] %v1885_v15  ;;  %v2046_v35 = vrot.slane %v2018_v14, %v3521_v60  ;;  %v2048_v43 = vcombine.high %v2032_v17, %v2032_v17  ;;  %v2049_v2 = vcombine.high %v2039_v26, %v2039_v26  ;;  %2061 = vst [vmem:[#allocation4 + $0x12] sm:$0x1] %v2047_v27 }
0x1970   :  { %2476 = vst.sshfl [vmem:[#allocation4 + $0x20] sm:$0x1 pattern:$0x73625140] %v1884_v19  ;;  %v2082_v25 = vrot.slane %v2068_v13, %v3521_v60  ;;  %v1914_v40 = vrot.slane %v1886_v24, %v3521_v60  ;;  %v1916_v28 = vcombine.high %v1900_v30, %v1900_v30  ;;  %v1917_v41 = vcombine.high %v1907_v3, %v1907_v3 }
0x1971   :  { %2486 = vst.sshfl [vmem:[#allocation4 + $0x3] sm:$0x1 pattern:$0x73625140] %v2075_v20  ;;  %1929 = vst [vmem:[#allocation4 + $0x10] sm:$0x1] %v1915_v5  ;;  %v2083_v31 = vcombine.high %v2075_v20, %v2075_v20  ;;  %v2050_v21 = vcombine.high %v2046_v35, %v2046_v35  ;;  %v2091_v36 = vrot.slane %v2075_v20, %v3521_v60 }
0x1972   :  { %2485 = vst.sshfl [vmem:[#allocation4 + $0x2a] sm:$0x1 pattern:$0x73625140] %v2018_v14  ;;  %2062 = vst [vmem:[#allocation4 + $0x1a] sm:$0x1] %v2049_v2  ;;  %v2084_v33 = vcombine.high %v2082_v25, %v2082_v25  ;;  %v2098_v45 = vrot.slane %v2082_v25, %v3521_v60  ;;  %v1918_v29 = vcombine.high %v1914_v40, %v1914_v40 }
0x1973   :  { %2477 = vst.sshfl [vmem:[#allocation4 + $0x28] sm:$0x1 pattern:$0x73625140] %v1886_v24  ;;  %2065 = vst [vmem:[#allocation4 + $0x32] sm:$0x1] %v2048_v43  ;;  %v2105_v37 = vrot.slane %v2083_v31, %v3521_v60  ;;  %v1936_v38 = vcombine.high %v1842_v8, %v1842_v8  ;;  %v1943_v34 = vrot.slane %v1842_v8, %v3521_v60 }
0x1974   :  { %2488 = vst.sshfl [vmem:[#allocation4 + $0x23] sm:$0x1 pattern:$0x73625140] %v2082_v25  ;;  %1930 = vst [vmem:[#allocation4 + $0x18] sm:$0x1] %v1917_v41  ;;  %v2112_v39 = vrot.slane %v2084_v33, %v3521_v60  ;;  %v2113_v42 = vcombine.high %v2091_v36, %v2091_v36  ;;  %v2114_v32 = vcombine.high %v2098_v45, %v2098_v45 }
0x1975   :  { %1933 = vst [vmem:[#allocation4 + $0x30] sm:$0x1] %v1916_v28  ;;  %2487 = vst.sshfl [vmem:[#allocation4 + $0xb] sm:$0x1 pattern:$0x73625140] %v2083_v31  ;;  %v2115_v23 = vcombine.high %v2105_v37, %v2105_v37  ;;  %v1950_v9 = vrot.slane %v1936_v38, %v3521_v60  ;;  %v1951_v51 = vcombine.high %v1943_v34, %v1943_v34 }
0x1976   :  { %2066 = vst [vmem:[#allocation4 + $0x3a] sm:$0x1] %v2050_v21  ;;  %2489 = vst.sshfl [vmem:[#allocation4 + $0x2b] sm:$0x1 pattern:$0x73625140] %v2084_v33  ;;  %v1959_v59 = vrot.slane %v1943_v34, %v3521_v60  ;;  %v2116_v44 = vcombine.high %v2112_v39, %v2112_v39 }
0x1977   :  { %1934 = vst [vmem:[#allocation4 + $0x38] sm:$0x1] %v1918_v29  ;;  %2478 = vst.sshfl [vmem:[#allocation4 + $0x1] sm:$0x1 pattern:$0x73625140] %v1943_v34  ;;  %v1952_v46 = vcombine.high %v1950_v9, %v1950_v9  ;;  %v1966_v47 = vrot.slane %v1950_v9, %v3521_v60  ;;  %v1973_v48 = vrot.slane %v1951_v51, %v3521_v60 }
0x1978   :  { %2127 = vst [vmem:[#allocation4 + $0x13] sm:$0x1] %v2113_v42  ;;  %2131 = vst [vmem:[#allocation4 + $0x33] sm:$0x1] %v2114_v32  ;;  %v1981_v53 = vcombine.high %v1959_v59, %v1959_v59 }
0x1979   :  { %2128 = vst [vmem:[#allocation4 + $0x1b] sm:$0x1] %v2115_v23  ;;  %2479 = vst.sshfl [vmem:[#allocation4 + $0x9] sm:$0x1 pattern:$0x73625140] %v1951_v51  ;;  %v1980_v54 = vrot.slane %v1952_v46, %v3521_v60  ;;  %v1982_v55 = vcombine.high %v1966_v47, %v1966_v47  ;;  %v1983_v56 = vcombine.high %v1973_v48, %v1973_v48 }
0x197a   :  { %2480 = vst.sshfl [vmem:[#allocation4 + $0x21] sm:$0x1 pattern:$0x73625140] %v1950_v9  ;;  %2132 = vst [vmem:[#allocation4 + $0x3b] sm:$0x1] %v2116_v44 }
0x197b   :  { %1995 = vst [vmem:[#allocation4 + $0x11] sm:$0x1] %v1981_v53  ;;  %2481 = vst.sshfl [vmem:[#allocation4 + $0x29] sm:$0x1 pattern:$0x73625140] %v1952_v46  ;;  %v1984_v57 = vcombine.high %v1980_v54, %v1980_v54 }
0x197c   :  { %1996 = vst [vmem:[#allocation4 + $0x19] sm:$0x1] %v1983_v56  ;;  %1999 = vst [vmem:[#allocation4 + $0x31] sm:$0x1] %v1982_v55 }
0x197d   :  { %2000 = vst [vmem:[#allocation4 + $0x39] sm:$0x1] %v1984_v57 }
0x19d3   :  { %v2810_v18 = vpop.f32.mrb[56].mxu1 }
0x19d4   :  { %v1863_v49 = vadd.f32 %v2810_v18, %v3519_v58  ;;  %v1854_v61 = vpop.f32.mrb[57].mxu1 }
0x19d5   :  { %v1855_v62 = vadd.f32 %v3519_v58, %v1854_v61  ;;  %v2811_v52 = vpop.f32.mrb[58].mxu1 }
0x19d6   :  { %v2266_v63 = vcombine.high %v1863_v49, %v1863_v49  ;;  %v2273_v0 = vrot.slane %v1863_v49, %v3521_v60  ;;  %v1866_v4 = vadd.f32 %v2811_v52, %v3519_v58  ;;  %v1857_v22 = vpop.f32.mrb[59].mxu1 }
0x19d7   :  { %v2134_v50 = vcombine.high %v1855_v62, %v1855_v62  ;;  %v2141_v1 = vrot.slane %v1855_v62, %v3521_v60  ;;  %v1858_v6 = vadd.f32 %v3519_v58, %v1857_v22 }
0x19d8   :  { %v2280_v7 = vrot.slane %v2266_v63, %v3521_v60  ;;  %v2281_v8 = vcombine.high %v2273_v0, %v2273_v0  ;;  %v2289_v10 = vrot.slane %v2273_v0, %v3521_v60  ;;  %2498 = vst.sshfl [vmem:[#allocation4 + $0x6] sm:$0x1 pattern:$0x73625140] %v2273_v0  ;;  %v2332_v11 = vcombine.high %v1866_v4, %v1866_v4 }
0x19d9   :  { %v2148_v12 = vrot.slane %v2134_v50, %v3521_v60  ;;  %v2149_v13 = vcombine.high %v2141_v1, %v2141_v1  ;;  %v2157_v19 = vrot.slane %v2141_v1, %v3521_v60  ;;  %2490 = vst.sshfl [vmem:[#allocation4 + $0x4] sm:$0x1 pattern:$0x73625140] %v2141_v1  ;;  %v2339_v15 = vrot.slane %v1866_v4, %v3521_v60 }
0x19da   :  { %v2282_v16 = vcombine.high %v2280_v7, %v2280_v7  ;;  %v2296_v20 = vrot.slane %v2280_v7, %v3521_v60  ;;  %v2303_v58 = vrot.slane %v2281_v8, %v3521_v60  ;;  %v2311_v14 = vcombine.high %v2289_v10, %v2289_v10  ;;  %2499 = vst.sshfl [vmem:[#allocation4 + $0xe] sm:$0x1 pattern:$0x73625140] %v2281_v8 }
0x19db   :  { %2500 = vst.sshfl [vmem:[#allocation4 + $0x26] sm:$0x1 pattern:$0x73625140] %v2280_v7  ;;  %v2150_v17 = vcombine.high %v2148_v12, %v2148_v12  ;;  %v2164_v26 = vrot.slane %v2148_v12, %v3521_v60  ;;  %v2171_v27 = vrot.slane %v2149_v13, %v3521_v60  ;;  %v2179_v24 = vcombine.high %v2157_v19, %v2157_v19 }
0x19dc   :  { %2491 = vst.sshfl [vmem:[#allocation4 + $0xc] sm:$0x1 pattern:$0x73625140] %v2149_v13  ;;  %v2310_v30 = vrot.slane %v2282_v16, %v3521_v60  ;;  %v2312_v3 = vcombine.high %v2296_v20, %v2296_v20  ;;  %v2313_v5 = vcombine.high %v2303_v58, %v2303_v58  ;;  %2325 = vst [vmem:[#allocation4 + $0x16] sm:$0x1] %v2311_v14 }
0x19dd   :  { %2492 = vst.sshfl [vmem:[#allocation4 + $0x24] sm:$0x1 pattern:$0x73625140] %v2148_v12  ;;  %v2346_v35 = vrot.slane %v2332_v11, %v3521_v60  ;;  %v2178_v43 = vrot.slane %v2150_v17, %v3521_v60  ;;  %v2180_v2 = vcombine.high %v2164_v26, %v2164_v26  ;;  %v2181_v25 = vcombine.high %v2171_v27, %v2171_v27 }
0x19de   :  { %2502 = vst.sshfl [vmem:[#allocation4 + $0x7] sm:$0x1 pattern:$0x73625140] %v2339_v15  ;;  %2193 = vst [vmem:[#allocation4 + $0x14] sm:$0x1] %v2179_v24  ;;  %v2347_v40 = vcombine.high %v2339_v15, %v2339_v15  ;;  %v2314_v28 = vcombine.high %v2310_v30, %v2310_v30  ;;  %v2355_v31 = vrot.slane %v2339_v15, %v3521_v60 }
0x19df   :  { %2501 = vst.sshfl [vmem:[#allocation4 + $0x2e] sm:$0x1 pattern:$0x73625140] %v2282_v16  ;;  %2326 = vst [vmem:[#allocation4 + $0x1e] sm:$0x1] %v2313_v5  ;;  %v2348_v41 = vcombine.high %v2346_v35, %v2346_v35  ;;  %v2362_v21 = vrot.slane %v2346_v35, %v3521_v60  ;;  %v2182_v33 = vcombine.high %v2178_v43, %v2178_v43 }
0x19e0   :  { %2493 = vst.sshfl [vmem:[#allocation4 + $0x2c] sm:$0x1 pattern:$0x73625140] %v2150_v17  ;;  %2329 = vst [vmem:[#allocation4 + $0x36] sm:$0x1] %v2312_v3  ;;  %v2369_v36 = vrot.slane %v2347_v40, %v3521_v60  ;;  %v2200_v45 = vcombine.high %v1858_v6, %v1858_v6  ;;  %v2207_v29 = vrot.slane %v1858_v6, %v3521_v60 }
0x19e1   :  { %2504 = vst.sshfl [vmem:[#allocation4 + $0x27] sm:$0x1 pattern:$0x73625140] %v2346_v35  ;;  %2194 = vst [vmem:[#allocation4 + $0x1c] sm:$0x1] %v2181_v25  ;;  %v2376_v37 = vrot.slane %v2348_v41, %v3521_v60  ;;  %v2377_v38 = vcombine.high %v2355_v31, %v2355_v31  ;;  %v2378_v34 = vcombine.high %v2362_v21, %v2362_v21 }
0x19e2   :  { %2197 = vst [vmem:[#allocation4 + $0x34] sm:$0x1] %v2180_v2  ;;  %2503 = vst.sshfl [vmem:[#allocation4 + $0xf] sm:$0x1 pattern:$0x73625140] %v2347_v40  ;;  %v2379_v39 = vcombine.high %v2369_v36, %v2369_v36  ;;  %v2214_v42 = vrot.slane %v2200_v45, %v3521_v60  ;;  %v2215_v32 = vcombine.high %v2207_v29, %v2207_v29 }
0x19e3   :  { %2330 = vst [vmem:[#allocation4 + $0x3e] sm:$0x1] %v2314_v28  ;;  %2505 = vst.sshfl [vmem:[#allocation4 + $0x2f] sm:$0x1 pattern:$0x73625140] %v2348_v41  ;;  %v2223_v23 = vrot.slane %v2207_v29, %v3521_v60  ;;  %v2380_v9 = vcombine.high %v2376_v37, %v2376_v37 }
0x19e4   :  { %2198 = vst [vmem:[#allocation4 + $0x3c] sm:$0x1] %v2182_v33  ;;  %2494 = vst.sshfl [vmem:[#allocation4 + $0x5] sm:$0x1 pattern:$0x73625140] %v2207_v29  ;;  %v2216_v51 = vcombine.high %v2214_v42, %v2214_v42  ;;  %v2230_v59 = vrot.slane %v2214_v42, %v3521_v60  ;;  %v2237_v44 = vrot.slane %v2215_v32, %v3521_v60 }
0x19e5   :  { %2391 = vst [vmem:[#allocation4 + $0x17] sm:$0x1] %v2377_v38  ;;  %2395 = vst [vmem:[#allocation4 + $0x37] sm:$0x1] %v2378_v34  ;;  %v2245_v46 = vcombine.high %v2223_v23, %v2223_v23 }
0x19e6   :  { %2392 = vst [vmem:[#allocation4 + $0x1f] sm:$0x1] %v2379_v39  ;;  %2495 = vst.sshfl [vmem:[#allocation4 + $0xd] sm:$0x1 pattern:$0x73625140] %v2215_v32  ;;  %v2244_v47 = vrot.slane %v2216_v51, %v3521_v60  ;;  %v2246_v48 = vcombine.high %v2230_v59, %v2230_v59  ;;  %v2247_v53 = vcombine.high %v2237_v44, %v2237_v44 }
0x19e7   :  { %2496 = vst.sshfl [vmem:[#allocation4 + $0x25] sm:$0x1 pattern:$0x73625140] %v2214_v42  ;;  %2396 = vst [vmem:[#allocation4 + $0x3f] sm:$0x1] %v2380_v9 }
0x19e8   :  { %2259 = vst [vmem:[#allocation4 + $0x15] sm:$0x1] %v2245_v46  ;;  %2497 = vst.sshfl [vmem:[#allocation4 + $0x2d] sm:$0x1 pattern:$0x73625140] %v2216_v51  ;;  %v2248_v54 = vcombine.high %v2244_v47, %v2244_v47 }
0x19e9   :  { %2260 = vst [vmem:[#allocation4 + $0x1d] sm:$0x1] %v2247_v53  ;;  %2263 = vst [vmem:[#allocation4 + $0x35] sm:$0x1] %v2246_v48 }
0x19ea   :  { %2264 = vst [vmem:[#allocation4 + $0x3d] sm:$0x1] %v2248_v54 }
0x19eb   :  { %2978 = shalt.err (!%p2975_p4)
}
0x19ec   :  { %s2979_s22 = scalar_lea.hbm %s3600_s9, 1024 }
0x19ed   :  { %p2980_p5 = scmp.ne.s32.totalorder %s3600_s9, %s2979_s22  ;;  %p2983_p6 = scmp.lt.u32.totalorder %s2979_s22, %s3600_s9 }
0x19ef   :  { %p2985_p7 = pnand %p2983_p6, %p2980_p5 }
0x19f1   :  { %2988 = shalt.err (!%p2985_p7)
}
0x19f2   :  { %s2998_s3 = smov 128   ;;  %s2999_s26 = smov 8  }
0x19f3   :  { %2408 = dma.vmem_to_hbm [thread:$0]  %s2403_s10, 1024, %s3600_s9, [#allocation5], %s2998_s3, %s2998_s3, %s2999_s26  }
0x19f4   :  { %2989 = dma.done.wait [#allocation5], 1024  }
0x19f5   :  { %2990 = vsyncadd [#allocation5], 4294966272 }
0x19f6   :  { %2412 = vsyncpa [#allocation5], 1 }

</bundles_post_ra>
